<compile_context>
chip_gen: v6e
topology: v6e:2x2x1
jax: 0.10.0
libtpu: 0.0.40
codegen_flags: <defaults>
</compile_context>

<pallas_src>
import functools

import numpy as np
import jax
import jax.numpy as jnp
from jax.experimental import pallas as pl
from jax.experimental.pallas import tpu as pltpu


@functools.lru_cache(maxsize=None)
def _conv_shift_matrix(N):
    """Static (NN, 9*NN) 0/1 matrix: column block m=(ki*3+kj) holds the shifted+masked
    view pad[ki:ki+N, kj:kj+N] of alpha, i.e. (alpha @ S)[:, m*NN+p] = alpha[p + off_m]
    with zero outside the NxN border."""
    NN = N * N
    S = np.zeros((NN, 9 * NN), np.float32)
    for ki in range(3):
        for kj in range(3):
            m = ki * 3 + kj
            dr, dc = ki - 1, kj - 1
            for r in range(N):
                rr = r + dr
                if not (0 <= rr < N):
                    continue
                for c in range(N):
                    cc = c + dc
                    if not (0 <= cc < N):
                        continue
                    S[rr * N + cc, m * NN + r * N + c] = 1.0
    return S


def _memory_kernel(*refs, neg_slope, inv_scale, use_h_for_gate, A, MD, NN, fold):
    f32 = jnp.float32
    if use_h_for_gate:
        (h_ref, am_ref, ap_ref, M_ref, sconv_ref,
         kw1_ref, kw2c_ref, gw1_ref, gw2_ref, ew_ref, bias_ref,
         out_ref, Mout_ref) = refs
        hp_ref = None
    else:
        (h_ref, hp_ref, am_ref, ap_ref, M_ref, sconv_ref,
         kw1_ref, kw2c_ref, gw1_ref, gw2_ref, ew_ref, bias_ref,
         out_ref, Mout_ref) = refs

    def leaky(x):
        return jnp.where(x > 0, x, neg_slope * x)

    def sigmoid(x):
        return 1.0 / (1.0 + jnp.exp(-x))

    def dot(x, y):
        return jnp.dot(x, y, preferred_element_type=f32)

    h = h_ref[...]                                    # (TB, H)
    am = am_ref[...]                                  # (TB, A+1) = [a_selected | mask]
    a_sel = am[:, :A]
    mask = am[:, A:A + 1]                             # (TB, 1) 1.0 -> flipped-kernel branch

    bias = bias_ref[...]                              # (1, 5*MD + 19)
    o = 0
    kb1 = bias[:, o:o + MD]; o += MD
    kb2c = bias[:, o:o + 18]; o += 18
    gb1 = bias[:, o:o + MD]; o += MD
    gb2 = bias[:, o:o + 1]; o += 1
    eb = bias[:, o:o + 3 * MD]

    # ---------------- gate input (F.normalize(h) - F.normalize(h_prev)) ----------------
    if use_h_for_gate:
        g_in = h
    else:
        hp = hp_ref[...]
        hn = h / jnp.maximum(jnp.sqrt(jnp.sum(h * h, axis=1, keepdims=True)), 1e-12)
        hpn = hp / jnp.maximum(jnp.sqrt(jnp.sum(hp * hp, axis=1, keepdims=True)), 1e-12)
        g_in = hn - hpn

    # ---------------- K head: shared layer-1, fused [normal|flipped] layer-2 -----------
    k1 = leaky(dot(a_sel, kw1_ref[...]) + kb1)        # (TB, MD)
    w18 = dot(k1, kw2c_ref[...]) + kb2c               # (TB, 18)
    w9 = (1.0 - mask) * w18[:, :9] + mask * w18[:, 9:]
    w9 = w9 * inv_scale
    w9 = w9 - jnp.max(w9, axis=1, keepdims=True)
    we = jnp.exp(w9)
    w = we / jnp.sum(we, axis=1, keepdims=True)       # (TB, 9) softmaxed 3x3 taps

    # ---------------- gate g = G(g_input) ----------------
    g1 = leaky(dot(g_in, gw1_ref[...]) + gb1)
    g = sigmoid(dot(g1, gw2_ref[...]) + gb2)          # (TB, 1)

    # ------- depthwise 3x3 conv: 9 shifted+masked views via ONE MXU matmul + 9 FMAs -----
    ap = ap_ref[...]                                  # (TB, NN)
    sh_all = dot(ap, sconv_ref[...])                  # (TB, 9*NN)
    conv = w[:, 0:1] * sh_all[:, :NN]
    for m in range(1, 9):
        conv = conv + w[:, m:m + 1] * sh_all[:, m * NN:(m + 1) * NN]
    alpha_t = conv * g + ap * (1.0 - g)               # (TB, NN)

    # ---------------- E head (single fused matmul) ----------------
    e3 = dot(h, ew_ref[...]) + eb                     # (TB, 3*MD)
    erase = sigmoid(e3[:, :MD])
    add_v = e3[:, MD:2 * MD]
    comp = e3[:, 2 * MD:]

    # ---------------- write + read on lane-folded memory slabs ----------------
    TB = h.shape[0]
    NQ = NN // fold
    W = fold * MD

    if fold > 1:
        erase_rep = jnp.concatenate([erase] * fold, axis=1)    # (TB, W)
        add_rep = jnp.concatenate([add_v] * fold, axis=1)      # (TB, W)
    else:
        erase_rep = erase
        add_rep = add_v

    # block-replication matrix Rep[k, j] = 1 for j in [k*MD, (k+1)*MD)  (iota, no div)
    jj = jax.lax.broadcasted_iota(jnp.int32, (fold, W), 1)
    kk = jax.lax.broadcasted_iota(jnp.int32, (fold, W), 0)
    rep = ((jj >= kk * MD) & (jj < (kk + 1) * MD)).astype(f32)

    mt_wide = jnp.zeros((TB, W), f32)
    for Q in range(NQ):
        m_slab = M_ref[:, Q, :]                                # (TB, W) 128-lane dense
        a_slab = alpha_t[:, Q * fold:(Q + 1) * fold]           # (TB, fold)
        a_b = dot(a_slab, rep)                                 # (TB, W) block broadcast
        new_slab = m_slab + a_b * (add_rep - erase_rep * m_slab)
        Mout_ref[:, Q, :] = new_slab
        mt_wide = mt_wide + a_b * new_slab

    mt = mt_wide[:, :MD]
    for k in range(1, fold):
        mt = mt + mt_wide[:, k * MD:(k + 1) * MD]              # (TB, MD)

    # single lane-dense packed output [m_t | comp | alpha_t]
    out_ref[...] = jnp.concatenate([mt, comp, alpha_t], axis=1)


def memory_forward(h, h_prev, a, alpha_prev, M, params, *, dataset_name, N,
                   neg_slope, devide_scale_for_softmax, use_h_for_gate=False,
                   block_b=256):
    f32 = jnp.float32
    h = h.astype(f32)
    h_prev = h_prev.astype(f32)
    a = a.astype(f32)
    alpha_prev = alpha_prev.astype(f32)
    M = M.astype(f32)

    B, H = h.shape
    A = a.shape[1]
    NN = N * N
    MD = params["kw1"].shape[1]

    # --- host-side 'gta'/argmax flip control folded into a pre-selected action + mask ---
    is_gta = 1.0 if "gta" in dataset_name else 0.0
    a_idx = jnp.argmax(a, axis=1)
    mask_b = is_gta * (a_idx == 0).astype(f32)                    # (B,)
    cond = mask_b > 0
    a_sel = a
    a_sel = a_sel.at[:, 2].set(jnp.where(cond, 1.0, a[:, 2]))
    a_sel = a_sel.at[:, 0].set(jnp.where(cond, 0.0, a[:, 0]))
    am = jnp.concatenate([a_sel, mask_b[:, None]], axis=1)        # (B, A+1)

    # --- parameter prep: fuse K layer-2 [normal | flipped], pack all biases -------------
    kw2c = jnp.concatenate([params["kw2"], params["kw2"][:, ::-1]], axis=1).astype(f32)
    kb2c = jnp.concatenate([params["kb2"], params["kb2"][:, ::-1]], axis=1)
    biases = jnp.concatenate(
        [params["kb1"], kb2c, params["gb1"], params["gb2"], params["eb"]],
        axis=1).astype(f32)                                       # (1, 5*MD + 19)

    # --- static conv shift/mask matrix (per-model constant, one-time 9*NN*NN*4 bytes) ---
    sconv = jnp.asarray(_conv_shift_matrix(N))                    # (NN, 9*NN)

    # --- batch tiling: never pad M; ragged last block handled by Pallas boundary logic --
    def rup(x, m):
        return ((x + m - 1) // m) * m

    if B <= 8:
        TB = B                                    # one exact block, no padding at all
    else:
        TB = rup(min(block_b, B), 8)
        if TB >= B:                               # keep >=2 grid steps for megacore
            TB = rup(pl.cdiv(B, 2), 8)
    grid_b = pl.cdiv(B, TB)
    B_pad = grid_b * TB
    pad = B_pad - B

    # pad only the small per-row tensors (cheap); M stays un-padded in HBM.
    hP = jnp.pad(h, ((0, pad), (0, 0)))
    amP = jnp.pad(am, ((0, pad), (0, 0)))
    apP = jnp.pad(alpha_prev, ((0, pad), (0, 0)))

    # --- fold memory rows so each slab is 128 lanes wide (dense VMEM / VPU / stores) ----
    fold = 128 // MD if (MD <= 128 and 128 % MD == 0
                         and NN % max(1, 128 // MD) == 0) else 1
    NQ = NN // fold
    W = fold * MD
    MF = M.reshape(B, NQ, W)

    def bmap2(b):
        return (b, 0)

    def bmap3(b):
        return (b, 0, 0)

    def wspec(shape):
        n = len(shape)
        return pl.BlockSpec(shape, lambda b, _n=n: (0,) * _n)

    inputs = [hP]
    in_specs = [pl.BlockSpec((TB, H), bmap2)]
    if not use_h_for_gate:
        hpP = jnp.pad(h_prev, ((0, pad), (0, 0)))
        inputs.append(hpP)
        in_specs.append(pl.BlockSpec((TB, H), bmap2))
    inputs += [amP, apP, MF, sconv,
               params["kw1"].astype(f32), kw2c, params["gw1"].astype(f32),
               params["gw2"].astype(f32), params["ew"].astype(f32), biases]
    in_specs += [
        pl.BlockSpec((TB, A + 1), bmap2),                  # [a_selected | mask]
        pl.BlockSpec((TB, NN), bmap2),                     # alpha_prev
        pl.BlockSpec((TB, NQ, W), bmap3),                  # M (lane-folded)
        wspec((NN, 9 * NN)),                               # conv shift/mask matrix
        wspec((A, MD)),                                    # kw1
        wspec((MD, 18)),                                   # [kw2 | kw2 flipped]
        wspec((H, MD)),                                    # gw1
        wspec((MD, 1)),                                    # gw2
        wspec((H, 3 * MD)),                                # ew (erase|add|comp fused)
        wspec((1, 5 * MD + 19)),                           # all biases packed
    ]
    m_in_idx = 3 if use_h_for_gate else 4                  # index of MF in `inputs`

    out_specs = (
        pl.BlockSpec((TB, 2 * MD + NN), bmap2),            # packed [m_t | comp | alpha_t]
        pl.BlockSpec((TB, NQ, W), bmap3),                  # M_new (lane-folded, aliased)
    )
    out_shape = (
        jax.ShapeDtypeStruct((B, 2 * MD + NN), f32),
        jax.ShapeDtypeStruct((B, NQ, W), f32),
    )

    # Donate M in place (only when MF is guaranteed to be a fresh reshape buffer).
    io_aliases = {m_in_idx: 1} if fold > 1 else {}

    kernel = functools.partial(
        _memory_kernel,
        neg_slope=neg_slope,
        inv_scale=1.0 / devide_scale_for_softmax,
        use_h_for_gate=use_h_for_gate,
        A=A, MD=MD, NN=NN, fold=fold,
    )

    packed, MF_new = pl.pallas_call(
        kernel,
        grid=(grid_b,),
        in_specs=in_specs,
        out_specs=out_specs,
        out_shape=out_shape,
        input_output_aliases=io_aliases,
        compiler_params=pltpu.CompilerParams(dimension_semantics=("parallel",)),
    )(*inputs)

    m_t = packed[:, :MD]
    comp_vec = packed[:, MD:2 * MD]
    alpha_t = packed[:, 2 * MD:]
    M_new = MF_new.reshape(B, NN, MD)
    return [m_t, comp_vec], M_new, alpha_t


def memory_reference(h, h_prev, a, alpha_prev, M, params, *, dataset_name, N,
                     neg_slope, devide_scale_for_softmax, use_h_for_gate=False):
    """Pure-JAX mirror of the torch forward (for verification)."""
    B, _ = h.shape
    NN = N * N
    MD = params["kw1"].shape[1]
    leaky = lambda x: jnp.where(x > 0, x, neg_slope * x)

    def K(x):
        y = leaky(x @ params["kw1"] + params["kb1"])
        return y @ params["kw2"] + params["kb2"]

    if use_h_for_gate:
        g_in = h
    else:
        hn = h / jnp.maximum(jnp.linalg.norm(h, axis=1, keepdims=True), 1e-12)
        hpn = h_prev / jnp.maximum(jnp.linalg.norm(h_prev, axis=1, keepdims=True), 1e-12)
        g_in = hn - hpn

    w = K(a)                                                     # (B, 9)
    is_gta = 1.0 if "gta" in dataset_name else 0.0
    a_idx = jnp.argmax(a, axis=1)
    mask = (is_gta * (a_idx == 0).astype(jnp.float32))[:, None]  # (B, 1)
    cond = mask[:, 0] > 0
    a_f = a
    a_f = a_f.at[:, 2].set(jnp.where(cond, 1.0, a[:, 2]))
    a_f = a_f.at[:, 0].set(jnp.where(cond, 0.0, a[:, 0]))
    w_f = K(a_f).reshape(B, 3, 3)[:, ::-1, ::-1].reshape(B, 9)
    w = (1.0 - mask) * w + mask * w_f
    w = jax.nn.softmax(w / devide_scale_for_softmax, axis=1)

    g1 = leaky(g_in @ params["gw1"] + params["gb1"])
    g = jax.nn.sigmoid(g1 @ params["gw2"] + params["gb2"])       # (B, 1)

    alpha2d = alpha_prev.reshape(B, N, N)
    pad = jnp.pad(alpha2d, ((0, 0), (1, 1), (1, 1)))
    conv = jnp.zeros((B, N, N), jnp.float32)
    for ki in range(3):
        for kj in range(3):
            conv = conv + w[:, ki * 3 + kj][:, None, None] * pad[:, ki:ki + N, kj:kj + N]
    alpha_t = conv.reshape(B, NN) * g + alpha_prev * (1.0 - g)

    e3 = h @ params["ew"] + params["eb"]
    erase = jax.nn.sigmoid(e3[:, :MD])
    add = e3[:, MD:2 * MD]
    comp = e3[:, 2 * MD:]
    M_new = (M * (1.0 - alpha_t[:, :, None] * erase[:, None, :])
             + alpha_t[:, :, None] * add[:, None, :])
    m_t = jnp.einsum('bq,bqc->bc', alpha_t, M_new)
    return [m_t, comp], M_new, alpha_t


def _run_case(key, B, H, A, MD, N, dataset_name, neg_slope, softmax_scale, block_b,
              use_h_for_gate=False):
    NN = N * N
    keys = jax.random.split(key, 10)

    def linear(k, fan_in, fan_out):
        k1, k2 = jax.random.split(k)
        bound = 1.0 / np.sqrt(fan_in)
        W = jax.random.uniform(k1, (fan_in, fan_out), jnp.float32, -bound, bound)
        b = jax.random.uniform(k2, (1, fan_out), jnp.float32, -bound, bound)
        return W, b

    kw1, kb1 = linear(keys[0], A, MD)
    kw2, kb2 = linear(keys[1], MD, 9)
    gw1, gb1 = linear(keys[2], H, MD)
    gw2, gb2 = linear(keys[3], MD, 1)
    ew, eb = linear(keys[4], H, 3 * MD)
    params = dict(kw1=kw1, kb1=kb1, kw2=kw2, kb2=kb2,
                  gw1=gw1, gb1=gb1, gw2=gw2, gb2=gb2, ew=ew, eb=eb)

    h = jax.random.normal(keys[5], (B, H), jnp.float32)
    h_prev = jax.random.normal(keys[6], (B, H), jnp.float32)
    a = jax.random.uniform(keys[7], (B, A), jnp.float32)
    a = a.at[0, 0].set(2.0)   # batch 0 exercises the 'gta' flip branch (argmax == 0)
    if B > 1:
        a = a.at[1, 1].set(2.0)   # batch 1 does not
    alpha_prev = jax.nn.softmax(jax.random.normal(keys[8], (B, NN), jnp.float32), axis=1)
    std = 1.0 / np.sqrt(NN + MD)
    M0 = jax.random.uniform(keys[9], (B, NN, MD), jnp.float32, -std, std)

    # reference first (kernel may donate its reshaped copy of M)
    (m_ref, c_ref), M_ref_out, alpha_ref_out = memory_reference(
        h, h_prev, a, alpha_prev, M0, params, dataset_name=dataset_name, N=N,
        neg_slope=neg_slope, devide_scale_for_softmax=softmax_scale,
        use_h_for_gate=use_h_for_gate)
    jax.block_until_ready((m_ref, c_ref, M_ref_out, alpha_ref_out))

    (m_t, comp_vec), M_new, alpha_t = memory_forward(
        h, h_prev, a, alpha_prev, M0, params, dataset_name=dataset_name, N=N,
        neg_slope=neg_slope, devide_scale_for_softmax=softmax_scale,
        use_h_for_gate=use_h_for_gate, block_b=block_b)
    jax.block_until_ready((m_t, comp_vec, M_new, alpha_t))

    np.testing.assert_allclose(np.asarray(m_t), np.asarray(m_ref), rtol=1e-3, atol=1e-3)
    np.testing.assert_allclose(np.asarray(comp_vec), np.asarray(c_ref), rtol=1e-3, atol=1e-3)
    np.testing.assert_allclose(np.asarray(M_new), np.asarray(M_ref_out), rtol=1e-3, atol=1e-3)
    np.testing.assert_allclose(np.asarray(alpha_t), np.asarray(alpha_ref_out), rtol=1e-3, atol=1e-3)


if __name__ == "__main__":
    key = jax.random.PRNGKey(0)
    k1, k2, k3 = jax.random.split(key, 3)

    # base config (matches the module's intended small shapes): single exact block
    _run_case(k1, B=2, H=32, A=4, MD=32, N=8,
              dataset_name="gta", neg_slope=0.2, softmax_scale=0.1, block_b=256)

    # odd batch + small tile: multi-step grid with a ragged (un-padded) last M block
    _run_case(k2, B=13, H=32, A=4, MD=32, N=8,
              dataset_name="gta", neg_slope=0.2, softmax_scale=0.1, block_b=8)

    # use_h_for_gate branch (h_prev input dropped from the kernel)
    _run_case(k3, B=2, H=32, A=4, MD=32, N=8,
              dataset_name="gta", neg_slope=0.2, softmax_scale=0.1, block_b=256,
              use_h_for_gate=True)

    print("KERNEL_OK")
</pallas_src>

<mosaic_0001>
module attributes {stable_mosaic.version = 11 : i64} {
  func.func @_memory_kernel(%arg0: i32, %arg1: memref<2x32xf32, #tpu.memory_space<vmem>>, %arg2: memref<2x32xf32, #tpu.memory_space<vmem>>, %arg3: memref<2x5xf32, #tpu.memory_space<vmem>>, %arg4: memref<2x64xf32, #tpu.memory_space<vmem>>, %arg5: memref<2x16x128xf32, #tpu.memory_space<vmem>>, %arg6: memref<64x576xf32, #tpu.memory_space<vmem>>, %arg7: memref<4x32xf32, #tpu.memory_space<vmem>>, %arg8: memref<32x18xf32, #tpu.memory_space<vmem>>, %arg9: memref<32x32xf32, #tpu.memory_space<vmem>>, %arg10: memref<32x1xf32, #tpu.memory_space<vmem>>, %arg11: memref<32x96xf32, #tpu.memory_space<vmem>>, %arg12: memref<1x179xf32, #tpu.memory_space<vmem>>, %arg13: memref<2x128xf32, #tpu.memory_space<vmem>>, %arg14: memref<2x16x128xf32, #tpu.memory_space<vmem>>) attributes {dimension_semantics = [#tpu.dimension_semantics<parallel>], iteration_bounds = array<i64: 1>, scalar_prefetch = 0 : i64, scratch_operands = 0 : i64, tpu.core_type = #tpu.core_type<tc>, window_params = [{transform_indices = @transform_0, window_bounds = array<i64: 2, 32>}, {transform_indices = @transform_1, window_bounds = array<i64: 2, 32>}, {transform_indices = @transform_2, window_bounds = array<i64: 2, 5>}, {transform_indices = @transform_3, window_bounds = array<i64: 2, 64>}, {transform_indices = @transform_4, window_bounds = array<i64: 2, 16, 128>}, {pipeline_mode = #tpu.pipeline_mode<synchronous>, transform_indices = @transform_5, window_bounds = array<i64: 64, 576>}, {pipeline_mode = #tpu.pipeline_mode<synchronous>, transform_indices = @transform_6, window_bounds = array<i64: 4, 32>}, {pipeline_mode = #tpu.pipeline_mode<synchronous>, transform_indices = @transform_7, window_bounds = array<i64: 32, 18>}, {pipeline_mode = #tpu.pipeline_mode<synchronous>, transform_indices = @transform_8, window_bounds = array<i64: 32, 32>}, {pipeline_mode = #tpu.pipeline_mode<synchronous>, transform_indices = @transform_9, window_bounds = array<i64: 32, 1>}, {pipeline_mode = #tpu.pipeline_mode<synchronous>, transform_indices = @transform_10, window_bounds = array<i64: 32, 96>}, {pipeline_mode = #tpu.pipeline_mode<synchronous>, transform_indices = @transform_11, window_bounds = array<i64: 1, 179>}, {transform_indices = @transform_12, window_bounds = array<i64: 2, 128>}, {transform_indices = @transform_13, window_bounds = array<i64: 2, 16, 128>}]} {
    %c0 = arith.constant 0 : index
    %c0_0 = arith.constant 0 : index
    %0 = vector.load %arg1[%c0, %c0_0] : memref<2x32xf32, #tpu.memory_space<vmem>>, vector<2x32xf32>
    %c0_1 = arith.constant 0 : index
    %c0_2 = arith.constant 0 : index
    %1 = vector.load %arg3[%c0_1, %c0_2] : memref<2x5xf32, #tpu.memory_space<vmem>>, vector<2x5xf32>
    %2 = vector.extract_strided_slice %1 {offsets = [0, 0], sizes = [2, 4], strides = [1, 1]} : vector<2x5xf32> to vector<2x4xf32>
    %3 = vector.extract_strided_slice %1 {offsets = [0, 4], sizes = [2, 1], strides = [1, 1]} : vector<2x5xf32> to vector<2x1xf32>
    %c0_3 = arith.constant 0 : index
    %c0_4 = arith.constant 0 : index
    %4 = vector.load %arg12[%c0_3, %c0_4] : memref<1x179xf32, #tpu.memory_space<vmem>>, vector<1x179xf32>
    %5 = vector.extract_strided_slice %4 {offsets = [0, 0], sizes = [1, 32], strides = [1, 1]} : vector<1x179xf32> to vector<1x32xf32>
    %6 = vector.extract_strided_slice %4 {offsets = [0, 32], sizes = [1, 18], strides = [1, 1]} : vector<1x179xf32> to vector<1x18xf32>
    %7 = vector.extract_strided_slice %4 {offsets = [0, 50], sizes = [1, 32], strides = [1, 1]} : vector<1x179xf32> to vector<1x32xf32>
    %8 = vector.extract_strided_slice %4 {offsets = [0, 82], sizes = [1, 1], strides = [1, 1]} : vector<1x179xf32> to vector<1x1xf32>
    %9 = vector.extract_strided_slice %4 {offsets = [0, 83], sizes = [1, 96], strides = [1, 1]} : vector<1x179xf32> to vector<1x96xf32>
    %c0_5 = arith.constant 0 : index
    %c0_6 = arith.constant 0 : index
    %10 = vector.load %arg2[%c0_5, %c0_6] : memref<2x32xf32, #tpu.memory_space<vmem>>, vector<2x32xf32>
    %11 = arith.mulf %0, %0 : vector<2x32xf32>
    %cst = arith.constant dense<0.000000e+00> : vector<2xf32>
    %12 = vector.multi_reduction <add>, %11, %cst [1] : vector<2x32xf32> to vector<2xf32>
    %13 = vector.shape_cast %12 : vector<2xf32> to vector<2x1xf32>
    %14 = math.sqrt %13 : vector<2x1xf32>
    %cst_7 = arith.constant 9.99999996E-13 : f32
    %15 = vector.broadcast %cst_7 : f32 to vector<2x1xf32>
    %16 = arith.maximumf %14, %15 : vector<2x1xf32>
    %17 = vector.broadcast %16 : vector<2x1xf32> to vector<2x32xf32>
    %18 = arith.divf %0, %17 : vector<2x32xf32>
    %19 = arith.mulf %10, %10 : vector<2x32xf32>
    %cst_8 = arith.constant dense<0.000000e+00> : vector<2xf32>
    %20 = vector.multi_reduction <add>, %19, %cst_8 [1] : vector<2x32xf32> to vector<2xf32>
    %21 = vector.shape_cast %20 : vector<2xf32> to vector<2x1xf32>
    %22 = math.sqrt %21 : vector<2x1xf32>
    %cst_9 = arith.constant 9.99999996E-13 : f32
    %23 = vector.broadcast %cst_9 : f32 to vector<2x1xf32>
    %24 = arith.maximumf %22, %23 : vector<2x1xf32>
    %25 = vector.broadcast %24 : vector<2x1xf32> to vector<2x32xf32>
    %26 = arith.divf %10, %25 : vector<2x32xf32>
    %27 = arith.subf %18, %26 : vector<2x32xf32>
    %c0_10 = arith.constant 0 : index
    %c0_11 = arith.constant 0 : index
    %28 = vector.load %arg7[%c0_10, %c0_11] : memref<4x32xf32, #tpu.memory_space<vmem>>, vector<4x32xf32>
    %cst_12 = arith.constant dense<0.000000e+00> : vector<2x32xf32>
    %29 = tpu.matmul %2, %28, %cst_12 {dimension_numbers = #tpu.dot_dimension_numbers<[1], [0], [0], [1], [0, 0, 1, 1], [], []>} : vector<2x4xf32>, vector<4x32xf32>, vector<2x32xf32> -> vector<2x32xf32>
    %30 = vector.broadcast %5 : vector<1x32xf32> to vector<2x32xf32>
    %31 = arith.addf %29, %30 : vector<2x32xf32>
    %cst_13 = arith.constant 0.000000e+00 : f32
    %32 = vector.broadcast %cst_13 : f32 to vector<2x32xf32>
    %33 = arith.cmpf ogt, %31, %32 : vector<2x32xf32>
    %cst_14 = arith.constant 2.000000e-01 : f32
    %34 = vector.broadcast %cst_14 : f32 to vector<2x32xf32>
    %35 = arith.mulf %34, %31 : vector<2x32xf32>
    %36 = arith.select %33, %31, %35 : vector<2x32xi1>, vector<2x32xf32>
    %c0_15 = arith.constant 0 : index
    %c0_16 = arith.constant 0 : index
    %37 = vector.load %arg8[%c0_15, %c0_16] : memref<32x18xf32, #tpu.memory_space<vmem>>, vector<32x18xf32>
    %cst_17 = arith.constant dense<0.000000e+00> : vector<2x18xf32>
    %38 = tpu.matmul %36, %37, %cst_17 {dimension_numbers = #tpu.dot_dimension_numbers<[1], [0], [0], [1], [0, 0, 1, 1], [], []>} : vector<2x32xf32>, vector<32x18xf32>, vector<2x18xf32> -> vector<2x18xf32>
    %39 = vector.broadcast %6 : vector<1x18xf32> to vector<2x18xf32>
    %40 = arith.addf %38, %39 : vector<2x18xf32>
    %cst_18 = arith.constant 1.000000e+00 : f32
    %41 = vector.broadcast %cst_18 : f32 to vector<2x1xf32>
    %42 = arith.subf %41, %3 : vector<2x1xf32>
    %43 = vector.extract_strided_slice %40 {offsets = [0, 0], sizes = [2, 9], strides = [1, 1]} : vector<2x18xf32> to vector<2x9xf32>
    %44 = vector.broadcast %42 : vector<2x1xf32> to vector<2x9xf32>
    %45 = arith.mulf %44, %43 : vector<2x9xf32>
    %46 = vector.extract_strided_slice %40 {offsets = [0, 9], sizes = [2, 9], strides = [1, 1]} : vector<2x18xf32> to vector<2x9xf32>
    %47 = vector.broadcast %3 : vector<2x1xf32> to vector<2x9xf32>
    %48 = arith.mulf %47, %46 : vector<2x9xf32>
    %49 = arith.addf %45, %48 : vector<2x9xf32>
    %cst_19 = arith.constant 1.000000e+01 : f32
    %50 = vector.broadcast %cst_19 : f32 to vector<2x9xf32>
    %51 = arith.mulf %49, %50 : vector<2x9xf32>
    %cst_20 = arith.constant dense<0xFF800000> : vector<2xf32>
    %52 = vector.multi_reduction <maximumf>, %51, %cst_20 [1] : vector<2x9xf32> to vector<2xf32>
    %53 = vector.shape_cast %52 : vector<2xf32> to vector<2x1xf32>
    %54 = vector.broadcast %53 : vector<2x1xf32> to vector<2x9xf32>
    %55 = arith.subf %51, %54 : vector<2x9xf32>
    %56 = math.exp %55 : vector<2x9xf32>
    %cst_21 = arith.constant dense<0.000000e+00> : vector<2xf32>
    %57 = vector.multi_reduction <add>, %56, %cst_21 [1] : vector<2x9xf32> to vector<2xf32>
    %58 = vector.shape_cast %57 : vector<2xf32> to vector<2x1xf32>
    %59 = vector.broadcast %58 : vector<2x1xf32> to vector<2x9xf32>
    %60 = arith.divf %56, %59 : vector<2x9xf32>
    %c0_22 = arith.constant 0 : index
    %c0_23 = arith.constant 0 : index
    %61 = vector.load %arg9[%c0_22, %c0_23] : memref<32x32xf32, #tpu.memory_space<vmem>>, vector<32x32xf32>
    %cst_24 = arith.constant dense<0.000000e+00> : vector<2x32xf32>
    %62 = tpu.matmul %27, %61, %cst_24 {dimension_numbers = #tpu.dot_dimension_numbers<[1], [0], [0], [1], [0, 0, 1, 1], [], []>} : vector<2x32xf32>, vector<32x32xf32>, vector<2x32xf32> -> vector<2x32xf32>
    %63 = vector.broadcast %7 : vector<1x32xf32> to vector<2x32xf32>
    %64 = arith.addf %62, %63 : vector<2x32xf32>
    %cst_25 = arith.constant 0.000000e+00 : f32
    %65 = vector.broadcast %cst_25 : f32 to vector<2x32xf32>
    %66 = arith.cmpf ogt, %64, %65 : vector<2x32xf32>
    %cst_26 = arith.constant 2.000000e-01 : f32
    %67 = vector.broadcast %cst_26 : f32 to vector<2x32xf32>
    %68 = arith.mulf %67, %64 : vector<2x32xf32>
    %69 = arith.select %66, %64, %68 : vector<2x32xi1>, vector<2x32xf32>
    %c0_27 = arith.constant 0 : index
    %c0_28 = arith.constant 0 : index
    %70 = vector.load %arg10[%c0_27, %c0_28] : memref<32x1xf32, #tpu.memory_space<vmem>>, vector<32x1xf32>
    %cst_29 = arith.constant dense<0.000000e+00> : vector<2x1xf32>
    %71 = tpu.matmul %69, %70, %cst_29 {dimension_numbers = #tpu.dot_dimension_numbers<[1], [0], [0], [1], [0, 0, 1, 1], [], []>} : vector<2x32xf32>, vector<32x1xf32>, vector<2x1xf32> -> vector<2x1xf32>
    %72 = vector.broadcast %8 : vector<1x1xf32> to vector<2x1xf32>
    %73 = arith.addf %71, %72 : vector<2x1xf32>
    %cst_30 = arith.constant 0.000000e+00 : f32
    %74 = vector.broadcast %cst_30 : f32 to vector<2x1xf32>
    %75 = arith.subf %74, %73 : vector<2x1xf32>
    %76 = math.exp %75 : vector<2x1xf32>
    %cst_31 = arith.constant 1.000000e+00 : f32
    %77 = vector.broadcast %cst_31 : f32 to vector<2x1xf32>
    %78 = arith.addf %77, %76 : vector<2x1xf32>
    %cst_32 = arith.constant 1.000000e+00 : f32
    %79 = vector.broadcast %cst_32 : f32 to vector<2x1xf32>
    %80 = arith.divf %79, %78 : vector<2x1xf32>
    %c0_33 = arith.constant 0 : index
    %c0_34 = arith.constant 0 : index
    %81 = vector.load %arg4[%c0_33, %c0_34] : memref<2x64xf32, #tpu.memory_space<vmem>>, vector<2x64xf32>
    %c0_35 = arith.constant 0 : index
    %c0_36 = arith.constant 0 : index
    %82 = vector.load %arg6[%c0_35, %c0_36] : memref<64x576xf32, #tpu.memory_space<vmem>>, vector<64x576xf32>
    %cst_37 = arith.constant dense<0.000000e+00> : vector<2x576xf32>
    %83 = tpu.matmul %81, %82, %cst_37 {dimension_numbers = #tpu.dot_dimension_numbers<[1], [0], [0], [1], [0, 0, 1, 1], [], []>} : vector<2x64xf32>, vector<64x576xf32>, vector<2x576xf32> -> vector<2x576xf32>
    %84 = vector.extract_strided_slice %60 {offsets = [0, 0], sizes = [2, 1], strides = [1, 1]} : vector<2x9xf32> to vector<2x1xf32>
    %85 = vector.extract_strided_slice %83 {offsets = [0, 0], sizes = [2, 64], strides = [1, 1]} : vector<2x576xf32> to vector<2x64xf32>
    %86 = vector.broadcast %84 : vector<2x1xf32> to vector<2x64xf32>
    %87 = arith.mulf %86, %85 : vector<2x64xf32>
    %88 = vector.extract_strided_slice %60 {offsets = [0, 1], sizes = [2, 1], strides = [1, 1]} : vector<2x9xf32> to vector<2x1xf32>
    %89 = vector.extract_strided_slice %83 {offsets = [0, 64], sizes = [2, 64], strides = [1, 1]} : vector<2x576xf32> to vector<2x64xf32>
    %90 = vector.broadcast %88 : vector<2x1xf32> to vector<2x64xf32>
    %91 = arith.mulf %90, %89 : vector<2x64xf32>
    %92 = arith.addf %87, %91 : vector<2x64xf32>
    %93 = vector.extract_strided_slice %60 {offsets = [0, 2], sizes = [2, 1], strides = [1, 1]} : vector<2x9xf32> to vector<2x1xf32>
    %94 = vector.extract_strided_slice %83 {offsets = [0, 128], sizes = [2, 64], strides = [1, 1]} : vector<2x576xf32> to vector<2x64xf32>
    %95 = vector.broadcast %93 : vector<2x1xf32> to vector<2x64xf32>
    %96 = arith.mulf %95, %94 : vector<2x64xf32>
    %97 = arith.addf %92, %96 : vector<2x64xf32>
    %98 = vector.extract_strided_slice %60 {offsets = [0, 3], sizes = [2, 1], strides = [1, 1]} : vector<2x9xf32> to vector<2x1xf32>
    %99 = vector.extract_strided_slice %83 {offsets = [0, 192], sizes = [2, 64], strides = [1, 1]} : vector<2x576xf32> to vector<2x64xf32>
    %100 = vector.broadcast %98 : vector<2x1xf32> to vector<2x64xf32>
    %101 = arith.mulf %100, %99 : vector<2x64xf32>
    %102 = arith.addf %97, %101 : vector<2x64xf32>
    %103 = vector.extract_strided_slice %60 {offsets = [0, 4], sizes = [2, 1], strides = [1, 1]} : vector<2x9xf32> to vector<2x1xf32>
    %104 = vector.extract_strided_slice %83 {offsets = [0, 256], sizes = [2, 64], strides = [1, 1]} : vector<2x576xf32> to vector<2x64xf32>
    %105 = vector.broadcast %103 : vector<2x1xf32> to vector<2x64xf32>
    %106 = arith.mulf %105, %104 : vector<2x64xf32>
    %107 = arith.addf %102, %106 : vector<2x64xf32>
    %108 = vector.extract_strided_slice %60 {offsets = [0, 5], sizes = [2, 1], strides = [1, 1]} : vector<2x9xf32> to vector<2x1xf32>
    %109 = vector.extract_strided_slice %83 {offsets = [0, 320], sizes = [2, 64], strides = [1, 1]} : vector<2x576xf32> to vector<2x64xf32>
    %110 = vector.broadcast %108 : vector<2x1xf32> to vector<2x64xf32>
    %111 = arith.mulf %110, %109 : vector<2x64xf32>
    %112 = arith.addf %107, %111 : vector<2x64xf32>
    %113 = vector.extract_strided_slice %60 {offsets = [0, 6], sizes = [2, 1], strides = [1, 1]} : vector<2x9xf32> to vector<2x1xf32>
    %114 = vector.extract_strided_slice %83 {offsets = [0, 384], sizes = [2, 64], strides = [1, 1]} : vector<2x576xf32> to vector<2x64xf32>
    %115 = vector.broadcast %113 : vector<2x1xf32> to vector<2x64xf32>
    %116 = arith.mulf %115, %114 : vector<2x64xf32>
    %117 = arith.addf %112, %116 : vector<2x64xf32>
    %118 = vector.extract_strided_slice %60 {offsets = [0, 7], sizes = [2, 1], strides = [1, 1]} : vector<2x9xf32> to vector<2x1xf32>
    %119 = vector.extract_strided_slice %83 {offsets = [0, 448], sizes = [2, 64], strides = [1, 1]} : vector<2x576xf32> to vector<2x64xf32>
    %120 = vector.broadcast %118 : vector<2x1xf32> to vector<2x64xf32>
    %121 = arith.mulf %120, %119 : vector<2x64xf32>
    %122 = arith.addf %117, %121 : vector<2x64xf32>
    %123 = vector.extract_strided_slice %60 {offsets = [0, 8], sizes = [2, 1], strides = [1, 1]} : vector<2x9xf32> to vector<2x1xf32>
    %124 = vector.extract_strided_slice %83 {offsets = [0, 512], sizes = [2, 64], strides = [1, 1]} : vector<2x576xf32> to vector<2x64xf32>
    %125 = vector.broadcast %123 : vector<2x1xf32> to vector<2x64xf32>
    %126 = arith.mulf %125, %124 : vector<2x64xf32>
    %127 = arith.addf %122, %126 : vector<2x64xf32>
    %128 = vector.broadcast %80 : vector<2x1xf32> to vector<2x64xf32>
    %129 = arith.mulf %127, %128 : vector<2x64xf32>
    %cst_38 = arith.constant 1.000000e+00 : f32
    %130 = vector.broadcast %cst_38 : f32 to vector<2x1xf32>
    %131 = arith.subf %130, %80 : vector<2x1xf32>
    %132 = vector.broadcast %131 : vector<2x1xf32> to vector<2x64xf32>
    %133 = arith.mulf %81, %132 : vector<2x64xf32>
    %134 = arith.addf %129, %133 : vector<2x64xf32>
    %c0_39 = arith.constant 0 : index
    %c0_40 = arith.constant 0 : index
    %135 = vector.load %arg11[%c0_39, %c0_40] : memref<32x96xf32, #tpu.memory_space<vmem>>, vector<32x96xf32>
    %cst_41 = arith.constant dense<0.000000e+00> : vector<2x96xf32>
    %136 = tpu.matmul %0, %135, %cst_41 {dimension_numbers = #tpu.dot_dimension_numbers<[1], [0], [0], [1], [0, 0, 1, 1], [], []>} : vector<2x32xf32>, vector<32x96xf32>, vector<2x96xf32> -> vector<2x96xf32>
    %137 = vector.broadcast %9 : vector<1x96xf32> to vector<2x96xf32>
    %138 = arith.addf %136, %137 : vector<2x96xf32>
    %139 = vector.extract_strided_slice %138 {offsets = [0, 0], sizes = [2, 32], strides = [1, 1]} : vector<2x96xf32> to vector<2x32xf32>
    %cst_42 = arith.constant 0.000000e+00 : f32
    %140 = vector.broadcast %cst_42 : f32 to vector<2x32xf32>
    %141 = arith.subf %140, %139 : vector<2x32xf32>
    %142 = math.exp %141 : vector<2x32xf32>
    %cst_43 = arith.constant 1.000000e+00 : f32
    %143 = vector.broadcast %cst_43 : f32 to vector<2x32xf32>
    %144 = arith.addf %143, %142 : vector<2x32xf32>
    %cst_44 = arith.constant 1.000000e+00 : f32
    %145 = vector.broadcast %cst_44 : f32 to vector<2x32xf32>
    %146 = arith.divf %145, %144 : vector<2x32xf32>
    %147 = vector.extract_strided_slice %138 {offsets = [0, 32], sizes = [2, 32], strides = [1, 1]} : vector<2x96xf32> to vector<2x32xf32>
    %148 = vector.extract_strided_slice %138 {offsets = [0, 64], sizes = [2, 32], strides = [1, 1]} : vector<2x96xf32> to vector<2x32xf32>
    %149 = tpu.concatenate %146, %146, %146, %146 in 1 : vector<2x32xf32>, vector<2x32xf32>, vector<2x32xf32>, vector<2x32xf32> -> vector<2x128xf32>
    %150 = tpu.concatenate %147, %147, %147, %147 in 1 : vector<2x32xf32>, vector<2x32xf32>, vector<2x32xf32>, vector<2x32xf32> -> vector<2x128xf32>
    %151 = tpu.iota {dimensions = array<i32: 1>} : vector<4x128xi32>
    %152 = tpu.iota {dimensions = array<i32: 0>} : vector<4x128xi32>
    %c32_i32 = arith.constant 32 : i32
    %153 = vector.broadcast %c32_i32 : i32 to vector<4x128xi32>
    %154 = arith.muli %152, %153 : vector<4x128xi32>
    %155 = arith.cmpi sge, %151, %154 : vector<4x128xi32>
    %c1_i32 = arith.constant 1 : i32
    %156 = vector.broadcast %c1_i32 : i32 to vector<4x128xi32>
    %157 = arith.addi %152, %156 : vector<4x128xi32>
    %c32_i32_45 = arith.constant 32 : i32
    %158 = vector.broadcast %c32_i32_45 : i32 to vector<4x128xi32>
    %159 = arith.muli %157, %158 : vector<4x128xi32>
    %160 = arith.cmpi slt, %151, %159 : vector<4x128xi32>
    %161 = arith.andi %155, %160 : vector<4x128xi1>
    %162 = arith.extui %161 : vector<4x128xi1> to vector<4x128xi32>
    %163 = arith.sitofp %162 : vector<4x128xi32> to vector<4x128xf32>
    %cst_46 = arith.constant 0.000000e+00 : f32
    %164 = vector.broadcast %cst_46 : f32 to vector<2x128xf32>
    %c0_47 = arith.constant 0 : index
    %c0_48 = arith.constant 0 : index
    %c0_49 = arith.constant 0 : index
    %165 = vector.load %arg5[%c0_47, %c0_48, %c0_49] : memref<2x16x128xf32, #tpu.memory_space<vmem>>, vector<2x1x128xf32>
    %166 = vector.shape_cast %165 : vector<2x1x128xf32> to vector<2x128xf32>
    %167 = vector.extract_strided_slice %134 {offsets = [0, 0], sizes = [2, 4], strides = [1, 1]} : vector<2x64xf32> to vector<2x4xf32>
    %cst_50 = arith.constant dense<0.000000e+00> : vector<2x128xf32>
    %168 = tpu.matmul %167, %163, %cst_50 {dimension_numbers = #tpu.dot_dimension_numbers<[1], [0], [0], [1], [0, 0, 1, 1], [], []>} : vector<2x4xf32>, vector<4x128xf32>, vector<2x128xf32> -> vector<2x128xf32>
    %169 = arith.mulf %149, %166 : vector<2x128xf32>
    %170 = arith.subf %150, %169 : vector<2x128xf32>
    %171 = arith.mulf %168, %170 : vector<2x128xf32>
    %172 = arith.addf %166, %171 : vector<2x128xf32>
    %c0_51 = arith.constant 0 : index
    %c0_52 = arith.constant 0 : index
    %c0_53 = arith.constant 0 : index
    %173 = vector.load %arg14[%c0_51, %c0_52, %c0_53] : memref<2x16x128xf32, #tpu.memory_space<vmem>>, vector<2x1x128xf32>
    %174 = vector.shape_cast %173 : vector<2x1x128xf32> to vector<2x128xf32>
    %175 = vector.shape_cast %172 : vector<2x128xf32> to vector<2x1x128xf32>
    tpu.vector_store %arg14[%c0_51, %c0_52, %c0_53], %175 {strides = array<i32>} : memref<2x16x128xf32, #tpu.memory_space<vmem>>, vector<2x1x128xf32>,
    %176 = arith.mulf %168, %172 : vector<2x128xf32>
    %177 = arith.addf %164, %176 : vector<2x128xf32>
    %c0_54 = arith.constant 0 : index
    %c1 = arith.constant 1 : index
    %c0_55 = arith.constant 0 : index
    %178 = vector.load %arg5[%c0_54, %c1, %c0_55] : memref<2x16x128xf32, #tpu.memory_space<vmem>>, vector<2x1x128xf32>
    %179 = vector.shape_cast %178 : vector<2x1x128xf32> to vector<2x128xf32>
    %180 = vector.extract_strided_slice %134 {offsets = [0, 4], sizes = [2, 4], strides = [1, 1]} : vector<2x64xf32> to vector<2x4xf32>
    %cst_56 = arith.constant dense<0.000000e+00> : vector<2x128xf32>
    %181 = tpu.matmul %180, %163, %cst_56 {dimension_numbers = #tpu.dot_dimension_numbers<[1], [0], [0], [1], [0, 0, 1, 1], [], []>} : vector<2x4xf32>, vector<4x128xf32>, vector<2x128xf32> -> vector<2x128xf32>
    %182 = arith.mulf %149, %179 : vector<2x128xf32>
    %183 = arith.subf %150, %182 : vector<2x128xf32>
    %184 = arith.mulf %181, %183 : vector<2x128xf32>
    %185 = arith.addf %179, %184 : vector<2x128xf32>
    %c0_57 = arith.constant 0 : index
    %c1_58 = arith.constant 1 : index
    %c0_59 = arith.constant 0 : index
    %186 = vector.load %arg14[%c0_57, %c1_58, %c0_59] : memref<2x16x128xf32, #tpu.memory_space<vmem>>, vector<2x1x128xf32>
    %187 = vector.shape_cast %186 : vector<2x1x128xf32> to vector<2x128xf32>
    %188 = vector.shape_cast %185 : vector<2x128xf32> to vector<2x1x128xf32>
    tpu.vector_store %arg14[%c0_57, %c1_58, %c0_59], %188 {strides = array<i32>} : memref<2x16x128xf32, #tpu.memory_space<vmem>>, vector<2x1x128xf32>,
    %189 = arith.mulf %181, %185 : vector<2x128xf32>
    %190 = arith.addf %177, %189 : vector<2x128xf32>
    %c0_60 = arith.constant 0 : index
    %c2 = arith.constant 2 : index
    %c0_61 = arith.constant 0 : index
    %191 = vector.load %arg5[%c0_60, %c2, %c0_61] : memref<2x16x128xf32, #tpu.memory_space<vmem>>, vector<2x1x128xf32>
    %192 = vector.shape_cast %191 : vector<2x1x128xf32> to vector<2x128xf32>
    %193 = vector.extract_strided_slice %134 {offsets = [0, 8], sizes = [2, 4], strides = [1, 1]} : vector<2x64xf32> to vector<2x4xf32>
    %cst_62 = arith.constant dense<0.000000e+00> : vector<2x128xf32>
    %194 = tpu.matmul %193, %163, %cst_62 {dimension_numbers = #tpu.dot_dimension_numbers<[1], [0], [0], [1], [0, 0, 1, 1], [], []>} : vector<2x4xf32>, vector<4x128xf32>, vector<2x128xf32> -> vector<2x128xf32>
    %195 = arith.mulf %149, %192 : vector<2x128xf32>
    %196 = arith.subf %150, %195 : vector<2x128xf32>
    %197 = arith.mulf %194, %196 : vector<2x128xf32>
    %198 = arith.addf %192, %197 : vector<2x128xf32>
    %c0_63 = arith.constant 0 : index
    %c2_64 = arith.constant 2 : index
    %c0_65 = arith.constant 0 : index
    %199 = vector.load %arg14[%c0_63, %c2_64, %c0_65] : memref<2x16x128xf32, #tpu.memory_space<vmem>>, vector<2x1x128xf32>
    %200 = vector.shape_cast %199 : vector<2x1x128xf32> to vector<2x128xf32>
    %201 = vector.shape_cast %198 : vector<2x128xf32> to vector<2x1x128xf32>
    tpu.vector_store %arg14[%c0_63, %c2_64, %c0_65], %201 {strides = array<i32>} : memref<2x16x128xf32, #tpu.memory_space<vmem>>, vector<2x1x128xf32>,
    %202 = arith.mulf %194, %198 : vector<2x128xf32>
    %203 = arith.addf %190, %202 : vector<2x128xf32>
    %c0_66 = arith.constant 0 : index
    %c3 = arith.constant 3 : index
    %c0_67 = arith.constant 0 : index
    %204 = vector.load %arg5[%c0_66, %c3, %c0_67] : memref<2x16x128xf32, #tpu.memory_space<vmem>>, vector<2x1x128xf32>
    %205 = vector.shape_cast %204 : vector<2x1x128xf32> to vector<2x128xf32>
    %206 = vector.extract_strided_slice %134 {offsets = [0, 12], sizes = [2, 4], strides = [1, 1]} : vector<2x64xf32> to vector<2x4xf32>
    %cst_68 = arith.constant dense<0.000000e+00> : vector<2x128xf32>
    %207 = tpu.matmul %206, %163, %cst_68 {dimension_numbers = #tpu.dot_dimension_numbers<[1], [0], [0], [1], [0, 0, 1, 1], [], []>} : vector<2x4xf32>, vector<4x128xf32>, vector<2x128xf32> -> vector<2x128xf32>
    %208 = arith.mulf %149, %205 : vector<2x128xf32>
    %209 = arith.subf %150, %208 : vector<2x128xf32>
    %210 = arith.mulf %207, %209 : vector<2x128xf32>
    %211 = arith.addf %205, %210 : vector<2x128xf32>
    %c0_69 = arith.constant 0 : index
    %c3_70 = arith.constant 3 : index
    %c0_71 = arith.constant 0 : index
    %212 = vector.load %arg14[%c0_69, %c3_70, %c0_71] : memref<2x16x128xf32, #tpu.memory_space<vmem>>, vector<2x1x128xf32>
    %213 = vector.shape_cast %212 : vector<2x1x128xf32> to vector<2x128xf32>
    %214 = vector.shape_cast %211 : vector<2x128xf32> to vector<2x1x128xf32>
    tpu.vector_store %arg14[%c0_69, %c3_70, %c0_71], %214 {strides = array<i32>} : memref<2x16x128xf32, #tpu.memory_space<vmem>>, vector<2x1x128xf32>,
    %215 = arith.mulf %207, %211 : vector<2x128xf32>
    %216 = arith.addf %203, %215 : vector<2x128xf32>
    %c0_72 = arith.constant 0 : index
    %c4 = arith.constant 4 : index
    %c0_73 = arith.constant 0 : index
    %217 = vector.load %arg5[%c0_72, %c4, %c0_73] : memref<2x16x128xf32, #tpu.memory_space<vmem>>, vector<2x1x128xf32>
    %218 = vector.shape_cast %217 : vector<2x1x128xf32> to vector<2x128xf32>
    %219 = vector.extract_strided_slice %134 {offsets = [0, 16], sizes = [2, 4], strides = [1, 1]} : vector<2x64xf32> to vector<2x4xf32>
    %cst_74 = arith.constant dense<0.000000e+00> : vector<2x128xf32>
    %220 = tpu.matmul %219, %163, %cst_74 {dimension_numbers = #tpu.dot_dimension_numbers<[1], [0], [0], [1], [0, 0, 1, 1], [], []>} : vector<2x4xf32>, vector<4x128xf32>, vector<2x128xf32> -> vector<2x128xf32>
    %221 = arith.mulf %149, %218 : vector<2x128xf32>
    %222 = arith.subf %150, %221 : vector<2x128xf32>
    %223 = arith.mulf %220, %222 : vector<2x128xf32>
    %224 = arith.addf %218, %223 : vector<2x128xf32>
    %c0_75 = arith.constant 0 : index
    %c4_76 = arith.constant 4 : index
    %c0_77 = arith.constant 0 : index
    %225 = vector.load %arg14[%c0_75, %c4_76, %c0_77] : memref<2x16x128xf32, #tpu.memory_space<vmem>>, vector<2x1x128xf32>
    %226 = vector.shape_cast %225 : vector<2x1x128xf32> to vector<2x128xf32>
    %227 = vector.shape_cast %224 : vector<2x128xf32> to vector<2x1x128xf32>
    tpu.vector_store %arg14[%c0_75, %c4_76, %c0_77], %227 {strides = array<i32>} : memref<2x16x128xf32, #tpu.memory_space<vmem>>, vector<2x1x128xf32>,
    %228 = arith.mulf %220, %224 : vector<2x128xf32>
    %229 = arith.addf %216, %228 : vector<2x128xf32>
    %c0_78 = arith.constant 0 : index
    %c5 = arith.constant 5 : index
    %c0_79 = arith.constant 0 : index
    %230 = vector.load %arg5[%c0_78, %c5, %c0_79] : memref<2x16x128xf32, #tpu.memory_space<vmem>>, vector<2x1x128xf32>
    %231 = vector.shape_cast %230 : vector<2x1x128xf32> to vector<2x128xf32>
    %232 = vector.extract_strided_slice %134 {offsets = [0, 20], sizes = [2, 4], strides = [1, 1]} : vector<2x64xf32> to vector<2x4xf32>
    %cst_80 = arith.constant dense<0.000000e+00> : vector<2x128xf32>
    %233 = tpu.matmul %232, %163, %cst_80 {dimension_numbers = #tpu.dot_dimension_numbers<[1], [0], [0], [1], [0, 0, 1, 1], [], []>} : vector<2x4xf32>, vector<4x128xf32>, vector<2x128xf32> -> vector<2x128xf32>
    %234 = arith.mulf %149, %231 : vector<2x128xf32>
    %235 = arith.subf %150, %234 : vector<2x128xf32>
    %236 = arith.mulf %233, %235 : vector<2x128xf32>
    %237 = arith.addf %231, %236 : vector<2x128xf32>
    %c0_81 = arith.constant 0 : index
    %c5_82 = arith.constant 5 : index
    %c0_83 = arith.constant 0 : index
    %238 = vector.load %arg14[%c0_81, %c5_82, %c0_83] : memref<2x16x128xf32, #tpu.memory_space<vmem>>, vector<2x1x128xf32>
    %239 = vector.shape_cast %238 : vector<2x1x128xf32> to vector<2x128xf32>
    %240 = vector.shape_cast %237 : vector<2x128xf32> to vector<2x1x128xf32>
    tpu.vector_store %arg14[%c0_81, %c5_82, %c0_83], %240 {strides = array<i32>} : memref<2x16x128xf32, #tpu.memory_space<vmem>>, vector<2x1x128xf32>,
    %241 = arith.mulf %233, %237 : vector<2x128xf32>
    %242 = arith.addf %229, %241 : vector<2x128xf32>
    %c0_84 = arith.constant 0 : index
    %c6 = arith.constant 6 : index
    %c0_85 = arith.constant 0 : index
    %243 = vector.load %arg5[%c0_84, %c6, %c0_85] : memref<2x16x128xf32, #tpu.memory_space<vmem>>, vector<2x1x128xf32>
    %244 = vector.shape_cast %243 : vector<2x1x128xf32> to vector<2x128xf32>
    %245 = vector.extract_strided_slice %134 {offsets = [0, 24], sizes = [2, 4], strides = [1, 1]} : vector<2x64xf32> to vector<2x4xf32>
    %cst_86 = arith.constant dense<0.000000e+00> : vector<2x128xf32>
    %246 = tpu.matmul %245, %163, %cst_86 {dimension_numbers = #tpu.dot_dimension_numbers<[1], [0], [0], [1], [0, 0, 1, 1], [], []>} : vector<2x4xf32>, vector<4x128xf32>, vector<2x128xf32> -> vector<2x128xf32>
    %247 = arith.mulf %149, %244 : vector<2x128xf32>
    %248 = arith.subf %150, %247 : vector<2x128xf32>
    %249 = arith.mulf %246, %248 : vector<2x128xf32>
    %250 = arith.addf %244, %249 : vector<2x128xf32>
    %c0_87 = arith.constant 0 : index
    %c6_88 = arith.constant 6 : index
    %c0_89 = arith.constant 0 : index
    %251 = vector.load %arg14[%c0_87, %c6_88, %c0_89] : memref<2x16x128xf32, #tpu.memory_space<vmem>>, vector<2x1x128xf32>
    %252 = vector.shape_cast %251 : vector<2x1x128xf32> to vector<2x128xf32>
    %253 = vector.shape_cast %250 : vector<2x128xf32> to vector<2x1x128xf32>
    tpu.vector_store %arg14[%c0_87, %c6_88, %c0_89], %253 {strides = array<i32>} : memref<2x16x128xf32, #tpu.memory_space<vmem>>, vector<2x1x128xf32>,
    %254 = arith.mulf %246, %250 : vector<2x128xf32>
    %255 = arith.addf %242, %254 : vector<2x128xf32>
    %c0_90 = arith.constant 0 : index
    %c7 = arith.constant 7 : index
    %c0_91 = arith.constant 0 : index
    %256 = vector.load %arg5[%c0_90, %c7, %c0_91] : memref<2x16x128xf32, #tpu.memory_space<vmem>>, vector<2x1x128xf32>
    %257 = vector.shape_cast %256 : vector<2x1x128xf32> to vector<2x128xf32>
    %258 = vector.extract_strided_slice %134 {offsets = [0, 28], sizes = [2, 4], strides = [1, 1]} : vector<2x64xf32> to vector<2x4xf32>
    %cst_92 = arith.constant dense<0.000000e+00> : vector<2x128xf32>
    %259 = tpu.matmul %258, %163, %cst_92 {dimension_numbers = #tpu.dot_dimension_numbers<[1], [0], [0], [1], [0, 0, 1, 1], [], []>} : vector<2x4xf32>, vector<4x128xf32>, vector<2x128xf32> -> vector<2x128xf32>
    %260 = arith.mulf %149, %257 : vector<2x128xf32>
    %261 = arith.subf %150, %260 : vector<2x128xf32>
    %262 = arith.mulf %259, %261 : vector<2x128xf32>
    %263 = arith.addf %257, %262 : vector<2x128xf32>
    %c0_93 = arith.constant 0 : index
    %c7_94 = arith.constant 7 : index
    %c0_95 = arith.constant 0 : index
    %264 = vector.load %arg14[%c0_93, %c7_94, %c0_95] : memref<2x16x128xf32, #tpu.memory_space<vmem>>, vector<2x1x128xf32>
    %265 = vector.shape_cast %264 : vector<2x1x128xf32> to vector<2x128xf32>
    %266 = vector.shape_cast %263 : vector<2x128xf32> to vector<2x1x128xf32>
    tpu.vector_store %arg14[%c0_93, %c7_94, %c0_95], %266 {strides = array<i32>} : memref<2x16x128xf32, #tpu.memory_space<vmem>>, vector<2x1x128xf32>,
    %267 = arith.mulf %259, %263 : vector<2x128xf32>
    %268 = arith.addf %255, %267 : vector<2x128xf32>
    %c0_96 = arith.constant 0 : index
    %c8 = arith.constant 8 : index
    %c0_97 = arith.constant 0 : index
    %269 = vector.load %arg5[%c0_96, %c8, %c0_97] : memref<2x16x128xf32, #tpu.memory_space<vmem>>, vector<2x1x128xf32>
    %270 = vector.shape_cast %269 : vector<2x1x128xf32> to vector<2x128xf32>
    %271 = vector.extract_strided_slice %134 {offsets = [0, 32], sizes = [2, 4], strides = [1, 1]} : vector<2x64xf32> to vector<2x4xf32>
    %cst_98 = arith.constant dense<0.000000e+00> : vector<2x128xf32>
    %272 = tpu.matmul %271, %163, %cst_98 {dimension_numbers = #tpu.dot_dimension_numbers<[1], [0], [0], [1], [0, 0, 1, 1], [], []>} : vector<2x4xf32>, vector<4x128xf32>, vector<2x128xf32> -> vector<2x128xf32>
    %273 = arith.mulf %149, %270 : vector<2x128xf32>
    %274 = arith.subf %150, %273 : vector<2x128xf32>
    %275 = arith.mulf %272, %274 : vector<2x128xf32>
    %276 = arith.addf %270, %275 : vector<2x128xf32>
    %c0_99 = arith.constant 0 : index
    %c8_100 = arith.constant 8 : index
    %c0_101 = arith.constant 0 : index
    %277 = vector.load %arg14[%c0_99, %c8_100, %c0_101] : memref<2x16x128xf32, #tpu.memory_space<vmem>>, vector<2x1x128xf32>
    %278 = vector.shape_cast %277 : vector<2x1x128xf32> to vector<2x128xf32>
    %279 = vector.shape_cast %276 : vector<2x128xf32> to vector<2x1x128xf32>
    tpu.vector_store %arg14[%c0_99, %c8_100, %c0_101], %279 {strides = array<i32>} : memref<2x16x128xf32, #tpu.memory_space<vmem>>, vector<2x1x128xf32>,
    %280 = arith.mulf %272, %276 : vector<2x128xf32>
    %281 = arith.addf %268, %280 : vector<2x128xf32>
    %c0_102 = arith.constant 0 : index
    %c9 = arith.constant 9 : index
    %c0_103 = arith.constant 0 : index
    %282 = vector.load %arg5[%c0_102, %c9, %c0_103] : memref<2x16x128xf32, #tpu.memory_space<vmem>>, vector<2x1x128xf32>
    %283 = vector.shape_cast %282 : vector<2x1x128xf32> to vector<2x128xf32>
    %284 = vector.extract_strided_slice %134 {offsets = [0, 36], sizes = [2, 4], strides = [1, 1]} : vector<2x64xf32> to vector<2x4xf32>
    %cst_104 = arith.constant dense<0.000000e+00> : vector<2x128xf32>
    %285 = tpu.matmul %284, %163, %cst_104 {dimension_numbers = #tpu.dot_dimension_numbers<[1], [0], [0], [1], [0, 0, 1, 1], [], []>} : vector<2x4xf32>, vector<4x128xf32>, vector<2x128xf32> -> vector<2x128xf32>
    %286 = arith.mulf %149, %283 : vector<2x128xf32>
    %287 = arith.subf %150, %286 : vector<2x128xf32>
    %288 = arith.mulf %285, %287 : vector<2x128xf32>
    %289 = arith.addf %283, %288 : vector<2x128xf32>
    %c0_105 = arith.constant 0 : index
    %c9_106 = arith.constant 9 : index
    %c0_107 = arith.constant 0 : index
    %290 = vector.load %arg14[%c0_105, %c9_106, %c0_107] : memref<2x16x128xf32, #tpu.memory_space<vmem>>, vector<2x1x128xf32>
    %291 = vector.shape_cast %290 : vector<2x1x128xf32> to vector<2x128xf32>
    %292 = vector.shape_cast %289 : vector<2x128xf32> to vector<2x1x128xf32>
    tpu.vector_store %arg14[%c0_105, %c9_106, %c0_107], %292 {strides = array<i32>} : memref<2x16x128xf32, #tpu.memory_space<vmem>>, vector<2x1x128xf32>,
    %293 = arith.mulf %285, %289 : vector<2x128xf32>
    %294 = arith.addf %281, %293 : vector<2x128xf32>
    %c0_108 = arith.constant 0 : index
    %c10 = arith.constant 10 : index
    %c0_109 = arith.constant 0 : index
    %295 = vector.load %arg5[%c0_108, %c10, %c0_109] : memref<2x16x128xf32, #tpu.memory_space<vmem>>, vector<2x1x128xf32>
    %296 = vector.shape_cast %295 : vector<2x1x128xf32> to vector<2x128xf32>
    %297 = vector.extract_strided_slice %134 {offsets = [0, 40], sizes = [2, 4], strides = [1, 1]} : vector<2x64xf32> to vector<2x4xf32>
    %cst_110 = arith.constant dense<0.000000e+00> : vector<2x128xf32>
    %298 = tpu.matmul %297, %163, %cst_110 {dimension_numbers = #tpu.dot_dimension_numbers<[1], [0], [0], [1], [0, 0, 1, 1], [], []>} : vector<2x4xf32>, vector<4x128xf32>, vector<2x128xf32> -> vector<2x128xf32>
    %299 = arith.mulf %149, %296 : vector<2x128xf32>
    %300 = arith.subf %150, %299 : vector<2x128xf32>
    %301 = arith.mulf %298, %300 : vector<2x128xf32>
    %302 = arith.addf %296, %301 : vector<2x128xf32>
    %c0_111 = arith.constant 0 : index
    %c10_112 = arith.constant 10 : index
    %c0_113 = arith.constant 0 : index
    %303 = vector.load %arg14[%c0_111, %c10_112, %c0_113] : memref<2x16x128xf32, #tpu.memory_space<vmem>>, vector<2x1x128xf32>
    %304 = vector.shape_cast %303 : vector<2x1x128xf32> to vector<2x128xf32>
    %305 = vector.shape_cast %302 : vector<2x128xf32> to vector<2x1x128xf32>
    tpu.vector_store %arg14[%c0_111, %c10_112, %c0_113], %305 {strides = array<i32>} : memref<2x16x128xf32, #tpu.memory_space<vmem>>, vector<2x1x128xf32>,
    %306 = arith.mulf %298, %302 : vector<2x128xf32>
    %307 = arith.addf %294, %306 : vector<2x128xf32>
    %c0_114 = arith.constant 0 : index
    %c11 = arith.constant 11 : index
    %c0_115 = arith.constant 0 : index
    %308 = vector.load %arg5[%c0_114, %c11, %c0_115] : memref<2x16x128xf32, #tpu.memory_space<vmem>>, vector<2x1x128xf32>
    %309 = vector.shape_cast %308 : vector<2x1x128xf32> to vector<2x128xf32>
    %310 = vector.extract_strided_slice %134 {offsets = [0, 44], sizes = [2, 4], strides = [1, 1]} : vector<2x64xf32> to vector<2x4xf32>
    %cst_116 = arith.constant dense<0.000000e+00> : vector<2x128xf32>
    %311 = tpu.matmul %310, %163, %cst_116 {dimension_numbers = #tpu.dot_dimension_numbers<[1], [0], [0], [1], [0, 0, 1, 1], [], []>} : vector<2x4xf32>, vector<4x128xf32>, vector<2x128xf32> -> vector<2x128xf32>
    %312 = arith.mulf %149, %309 : vector<2x128xf32>
    %313 = arith.subf %150, %312 : vector<2x128xf32>
    %314 = arith.mulf %311, %313 : vector<2x128xf32>
    %315 = arith.addf %309, %314 : vector<2x128xf32>
    %c0_117 = arith.constant 0 : index
    %c11_118 = arith.constant 11 : index
    %c0_119 = arith.constant 0 : index
    %316 = vector.load %arg14[%c0_117, %c11_118, %c0_119] : memref<2x16x128xf32, #tpu.memory_space<vmem>>, vector<2x1x128xf32>
    %317 = vector.shape_cast %316 : vector<2x1x128xf32> to vector<2x128xf32>
    %318 = vector.shape_cast %315 : vector<2x128xf32> to vector<2x1x128xf32>
    tpu.vector_store %arg14[%c0_117, %c11_118, %c0_119], %318 {strides = array<i32>} : memref<2x16x128xf32, #tpu.memory_space<vmem>>, vector<2x1x128xf32>,
    %319 = arith.mulf %311, %315 : vector<2x128xf32>
    %320 = arith.addf %307, %319 : vector<2x128xf32>
    %c0_120 = arith.constant 0 : index
    %c12 = arith.constant 12 : index
    %c0_121 = arith.constant 0 : index
    %321 = vector.load %arg5[%c0_120, %c12, %c0_121] : memref<2x16x128xf32, #tpu.memory_space<vmem>>, vector<2x1x128xf32>
    %322 = vector.shape_cast %321 : vector<2x1x128xf32> to vector<2x128xf32>
    %323 = vector.extract_strided_slice %134 {offsets = [0, 48], sizes = [2, 4], strides = [1, 1]} : vector<2x64xf32> to vector<2x4xf32>
    %cst_122 = arith.constant dense<0.000000e+00> : vector<2x128xf32>
    %324 = tpu.matmul %323, %163, %cst_122 {dimension_numbers = #tpu.dot_dimension_numbers<[1], [0], [0], [1], [0, 0, 1, 1], [], []>} : vector<2x4xf32>, vector<4x128xf32>, vector<2x128xf32> -> vector<2x128xf32>
    %325 = arith.mulf %149, %322 : vector<2x128xf32>
    %326 = arith.subf %150, %325 : vector<2x128xf32>
    %327 = arith.mulf %324, %326 : vector<2x128xf32>
    %328 = arith.addf %322, %327 : vector<2x128xf32>
    %c0_123 = arith.constant 0 : index
    %c12_124 = arith.constant 12 : index
    %c0_125 = arith.constant 0 : index
    %329 = vector.load %arg14[%c0_123, %c12_124, %c0_125] : memref<2x16x128xf32, #tpu.memory_space<vmem>>, vector<2x1x128xf32>
    %330 = vector.shape_cast %329 : vector<2x1x128xf32> to vector<2x128xf32>
    %331 = vector.shape_cast %328 : vector<2x128xf32> to vector<2x1x128xf32>
    tpu.vector_store %arg14[%c0_123, %c12_124, %c0_125], %331 {strides = array<i32>} : memref<2x16x128xf32, #tpu.memory_space<vmem>>, vector<2x1x128xf32>,
    %332 = arith.mulf %324, %328 : vector<2x128xf32>
    %333 = arith.addf %320, %332 : vector<2x128xf32>
    %c0_126 = arith.constant 0 : index
    %c13 = arith.constant 13 : index
    %c0_127 = arith.constant 0 : index
    %334 = vector.load %arg5[%c0_126, %c13, %c0_127] : memref<2x16x128xf32, #tpu.memory_space<vmem>>, vector<2x1x128xf32>
    %335 = vector.shape_cast %334 : vector<2x1x128xf32> to vector<2x128xf32>
    %336 = vector.extract_strided_slice %134 {offsets = [0, 52], sizes = [2, 4], strides = [1, 1]} : vector<2x64xf32> to vector<2x4xf32>
    %cst_128 = arith.constant dense<0.000000e+00> : vector<2x128xf32>
    %337 = tpu.matmul %336, %163, %cst_128 {dimension_numbers = #tpu.dot_dimension_numbers<[1], [0], [0], [1], [0, 0, 1, 1], [], []>} : vector<2x4xf32>, vector<4x128xf32>, vector<2x128xf32> -> vector<2x128xf32>
    %338 = arith.mulf %149, %335 : vector<2x128xf32>
    %339 = arith.subf %150, %338 : vector<2x128xf32>
    %340 = arith.mulf %337, %339 : vector<2x128xf32>
    %341 = arith.addf %335, %340 : vector<2x128xf32>
    %c0_129 = arith.constant 0 : index
    %c13_130 = arith.constant 13 : index
    %c0_131 = arith.constant 0 : index
    %342 = vector.load %arg14[%c0_129, %c13_130, %c0_131] : memref<2x16x128xf32, #tpu.memory_space<vmem>>, vector<2x1x128xf32>
    %343 = vector.shape_cast %342 : vector<2x1x128xf32> to vector<2x128xf32>
    %344 = vector.shape_cast %341 : vector<2x128xf32> to vector<2x1x128xf32>
    tpu.vector_store %arg14[%c0_129, %c13_130, %c0_131], %344 {strides = array<i32>} : memref<2x16x128xf32, #tpu.memory_space<vmem>>, vector<2x1x128xf32>,
    %345 = arith.mulf %337, %341 : vector<2x128xf32>
    %346 = arith.addf %333, %345 : vector<2x128xf32>
    %c0_132 = arith.constant 0 : index
    %c14 = arith.constant 14 : index
    %c0_133 = arith.constant 0 : index
    %347 = vector.load %arg5[%c0_132, %c14, %c0_133] : memref<2x16x128xf32, #tpu.memory_space<vmem>>, vector<2x1x128xf32>
    %348 = vector.shape_cast %347 : vector<2x1x128xf32> to vector<2x128xf32>
    %349 = vector.extract_strided_slice %134 {offsets = [0, 56], sizes = [2, 4], strides = [1, 1]} : vector<2x64xf32> to vector<2x4xf32>
    %cst_134 = arith.constant dense<0.000000e+00> : vector<2x128xf32>
    %350 = tpu.matmul %349, %163, %cst_134 {dimension_numbers = #tpu.dot_dimension_numbers<[1], [0], [0], [1], [0, 0, 1, 1], [], []>} : vector<2x4xf32>, vector<4x128xf32>, vector<2x128xf32> -> vector<2x128xf32>
    %351 = arith.mulf %149, %348 : vector<2x128xf32>
    %352 = arith.subf %150, %351 : vector<2x128xf32>
    %353 = arith.mulf %350, %352 : vector<2x128xf32>
    %354 = arith.addf %348, %353 : vector<2x128xf32>
    %c0_135 = arith.constant 0 : index
    %c14_136 = arith.constant 14 : index
    %c0_137 = arith.constant 0 : index
    %355 = vector.load %arg14[%c0_135, %c14_136, %c0_137] : memref<2x16x128xf32, #tpu.memory_space<vmem>>, vector<2x1x128xf32>
    %356 = vector.shape_cast %355 : vector<2x1x128xf32> to vector<2x128xf32>
    %357 = vector.shape_cast %354 : vector<2x128xf32> to vector<2x1x128xf32>
    tpu.vector_store %arg14[%c0_135, %c14_136, %c0_137], %357 {strides = array<i32>} : memref<2x16x128xf32, #tpu.memory_space<vmem>>, vector<2x1x128xf32>,
    %358 = arith.mulf %350, %354 : vector<2x128xf32>
    %359 = arith.addf %346, %358 : vector<2x128xf32>
    %c0_138 = arith.constant 0 : index
    %c15 = arith.constant 15 : index
    %c0_139 = arith.constant 0 : index
    %360 = vector.load %arg5[%c0_138, %c15, %c0_139] : memref<2x16x128xf32, #tpu.memory_space<vmem>>, vector<2x1x128xf32>
    %361 = vector.shape_cast %360 : vector<2x1x128xf32> to vector<2x128xf32>
    %362 = vector.extract_strided_slice %134 {offsets = [0, 60], sizes = [2, 4], strides = [1, 1]} : vector<2x64xf32> to vector<2x4xf32>
    %cst_140 = arith.constant dense<0.000000e+00> : vector<2x128xf32>
    %363 = tpu.matmul %362, %163, %cst_140 {dimension_numbers = #tpu.dot_dimension_numbers<[1], [0], [0], [1], [0, 0, 1, 1], [], []>} : vector<2x4xf32>, vector<4x128xf32>, vector<2x128xf32> -> vector<2x128xf32>
    %364 = arith.mulf %149, %361 : vector<2x128xf32>
    %365 = arith.subf %150, %364 : vector<2x128xf32>
    %366 = arith.mulf %363, %365 : vector<2x128xf32>
    %367 = arith.addf %361, %366 : vector<2x128xf32>
    %c0_141 = arith.constant 0 : index
    %c15_142 = arith.constant 15 : index
    %c0_143 = arith.constant 0 : index
    %368 = vector.load %arg14[%c0_141, %c15_142, %c0_143] : memref<2x16x128xf32, #tpu.memory_space<vmem>>, vector<2x1x128xf32>
    %369 = vector.shape_cast %368 : vector<2x1x128xf32> to vector<2x128xf32>
    %370 = vector.shape_cast %367 : vector<2x128xf32> to vector<2x1x128xf32>
    tpu.vector_store %arg14[%c0_141, %c15_142, %c0_143], %370 {strides = array<i32>} : memref<2x16x128xf32, #tpu.memory_space<vmem>>, vector<2x1x128xf32>,
    %371 = arith.mulf %363, %367 : vector<2x128xf32>
    %372 = arith.addf %359, %371 : vector<2x128xf32>
    %373 = vector.extract_strided_slice %372 {offsets = [0, 0], sizes = [2, 32], strides = [1, 1]} : vector<2x128xf32> to vector<2x32xf32>
    %374 = vector.extract_strided_slice %372 {offsets = [0, 32], sizes = [2, 32], strides = [1, 1]} : vector<2x128xf32> to vector<2x32xf32>
    %375 = arith.addf %373, %374 : vector<2x32xf32>
    %376 = vector.extract_strided_slice %372 {offsets = [0, 64], sizes = [2, 32], strides = [1, 1]} : vector<2x128xf32> to vector<2x32xf32>
    %377 = arith.addf %375, %376 : vector<2x32xf32>
    %378 = vector.extract_strided_slice %372 {offsets = [0, 96], sizes = [2, 32], strides = [1, 1]} : vector<2x128xf32> to vector<2x32xf32>
    %379 = arith.addf %377, %378 : vector<2x32xf32>
    %380 = tpu.concatenate %379, %148, %134 in 1 : vector<2x32xf32>, vector<2x32xf32>, vector<2x64xf32> -> vector<2x128xf32>
    %c0_144 = arith.constant 0 : index
    %c0_145 = arith.constant 0 : index
    %381 = vector.load %arg13[%c0_144, %c0_145] : memref<2x128xf32, #tpu.memory_space<vmem>>, vector<2x128xf32>
    tpu.vector_store %arg13[%c0_144, %c0_145], %380 {strides = array<i32>} : memref<2x128xf32, #tpu.memory_space<vmem>>, vector<2x128xf32>,
    return
  }
  func.func @transform_0(%arg0: i32) -> (i32, i32) {
    %c0_i32 = arith.constant 0 : i32
    %c0_i32_0 = arith.constant 0 : i32
    return %arg0, %c0_i32 : i32, i32
  }
  func.func @transform_1(%arg0: i32) -> (i32, i32) {
    %c0_i32 = arith.constant 0 : i32
    %c0_i32_0 = arith.constant 0 : i32
    return %arg0, %c0_i32 : i32, i32
  }
  func.func @transform_2(%arg0: i32) -> (i32, i32) {
    %c0_i32 = arith.constant 0 : i32
    %c0_i32_0 = arith.constant 0 : i32
    return %arg0, %c0_i32 : i32, i32
  }
  func.func @transform_3(%arg0: i32) -> (i32, i32) {
    %c0_i32 = arith.constant 0 : i32
    %c0_i32_0 = arith.constant 0 : i32
    return %arg0, %c0_i32 : i32, i32
  }
  func.func @transform_4(%arg0: i32) -> (i32, i32, i32) {
    %c0_i32 = arith.constant 0 : i32
    %c0_i32_0 = arith.constant 0 : i32
    %c0_i32_1 = arith.constant 0 : i32
    return %arg0, %c0_i32, %c0_i32_0 : i32, i32, i32
  }
  func.func @transform_5(%arg0: i32) -> (i32, i32) {
    %c0_i32 = arith.constant 0 : i32
    %c0_i32_0 = arith.constant 0 : i32
    %c0_i32_1 = arith.constant 0 : i32
    return %c0_i32, %c0_i32_0 : i32, i32
  }
  func.func @transform_6(%arg0: i32) -> (i32, i32) {
    %c0_i32 = arith.constant 0 : i32
    %c0_i32_0 = arith.constant 0 : i32
    %c0_i32_1 = arith.constant 0 : i32
    return %c0_i32, %c0_i32_0 : i32, i32
  }
  func.func @transform_7(%arg0: i32) -> (i32, i32) {
    %c0_i32 = arith.constant 0 : i32
    %c0_i32_0 = arith.constant 0 : i32
    %c0_i32_1 = arith.constant 0 : i32
    return %c0_i32, %c0_i32_0 : i32, i32
  }
  func.func @transform_8(%arg0: i32) -> (i32, i32) {
    %c0_i32 = arith.constant 0 : i32
    %c0_i32_0 = arith.constant 0 : i32
    %c0_i32_1 = arith.constant 0 : i32
    return %c0_i32, %c0_i32_0 : i32, i32
  }
  func.func @transform_9(%arg0: i32) -> (i32, i32) {
    %c0_i32 = arith.constant 0 : i32
    %c0_i32_0 = arith.constant 0 : i32
    %c0_i32_1 = arith.constant 0 : i32
    return %c0_i32, %c0_i32_0 : i32, i32
  }
  func.func @transform_10(%arg0: i32) -> (i32, i32) {
    %c0_i32 = arith.constant 0 : i32
    %c0_i32_0 = arith.constant 0 : i32
    %c0_i32_1 = arith.constant 0 : i32
    return %c0_i32, %c0_i32_0 : i32, i32
  }
  func.func @transform_11(%arg0: i32) -> (i32, i32) {
    %c0_i32 = arith.constant 0 : i32
    %c0_i32_0 = arith.constant 0 : i32
    %c0_i32_1 = arith.constant 0 : i32
    return %c0_i32, %c0_i32_0 : i32, i32
  }
  func.func @transform_12(%arg0: i32) -> (i32, i32) {
    %c0_i32 = arith.constant 0 : i32
    %c0_i32_0 = arith.constant 0 : i32
    return %arg0, %c0_i32 : i32, i32
  }
  func.func @transform_13(%arg0: i32) -> (i32, i32, i32) {
    %c0_i32 = arith.constant 0 : i32
    %c0_i32_0 = arith.constant 0 : i32
    %c0_i32_1 = arith.constant 0 : i32
    return %arg0, %c0_i32, %c0_i32_0 : i32, i32, i32
  }
}

</mosaic_0001>

<bundles_post_ra>
// kernel: tpu_custom_call.1
= control target key start
LH: loop header
LB: loop body
LE: loop exit
PB: predicated region body
PF: predicated region fallthrough
CT: control target
= control target key end

     0   :  { %19 = vsyncpa [#allocation3], 0  ;;  %s3726_s0 = inlined_call_operand.vmem [shape: f32[2,32], index: 0, kind: input, shape index: {}]   ;;  %s3727_s1 = inlined_call_operand.vmem [shape: f32[2,32], index: 1, kind: input, shape index: {}]   ;;  %s3728_s2 = inlined_call_operand.vmem [shape: f32[2,5], index: 2, kind: input, shape index: {}]   ;;  %s3729_s3 = inlined_call_operand.vmem [shape: f32[2,64], index: 3, kind: input, shape index: {}]   ;;  %s3730_s4 = inlined_call_operand.hbm [shape: f32[2,16,128], index: 4, kind: input, shape index: {}, may-alias: {4,13}]   ;;  %s3731_s5 = inlined_call_operand.hbm [shape: f32[64,576], index: 5, kind: input, shape index: {}]   ;;  %s3732_s6 = inlined_call_operand.vmem [shape: f32[4,32], index: 6, kind: input, shape index: {}]   ;;  %s3733_s7 = inlined_call_operand.vmem [shape: f32[32,18], index: 7, kind: input, shape index: {}]   ;;  %s3734_s8 = inlined_call_operand.vmem [shape: f32[32,32], index: 8, kind: input, shape index: {}]   ;;  %s3735_s9 = inlined_call_operand.vmem [shape: f32[32,1], index: 9, kind: input, shape index: {}]   ;;  %s3736_s10 = inlined_call_operand.vmem [shape: f32[32,96], index: 10, kind: input, shape index: {}]   ;;  %s3737_s11 = inlined_call_operand.vmem [shape: f32[1,179], index: 11, kind: input, shape index: {}]   ;;  %s3738_s12 = inlined_call_operand.hbm [shape: f32[2,128], index: 12, kind: output, shape index: {0}]   ;;  %s3739_s13 = inlined_call_operand.hbm [shape: f32[2,16,128], index: 13, kind: output, shape index: {1}, may-alias: {4,13}]  }
   0x1   :  { %20 = vsyncpa [#allocation6], 0 }
   0x2   :  { %21 = vsyncpa [#allocation4], 0 }
   0x3   :  { %22 = vsyncpa [#allocation9], 0  ;;  %s3000_s25 = smov [#allocation2]  }
   0x4   :  { %s36_s26 = sshll.u32 %s3000_s25, 4  ;;  %s37_s26 = int_to_ptr.vmem [resolvable:$true] %s36_s26 }
   0x5   :  { %s2920_s27 = scalar_lea.vmem %s37_s26, 512  ;;  %p2925_p1 = scmp.lt.s32.totalorder %s37_s26, %s37_s26 }
   0x6   :  { %p2921_p0 = scmp.ne.s32.totalorder %s37_s26, %s2920_s27  ;;  %p2926_p2 = scmp.lt.s32.totalorder %s2920_s27, %s2920_s27 }
   0x8   :  { %p2927_p3 = por %p2926_p2, %p2925_p1 }
   0xa   :  { %p2928_p4 = pnand %p2927_p3, %p2921_p0 }
   0xc   :  { %2931 = shalt.err (!%p2928_p4)
}
   0xd   :  { %s3001_s28 = smov 128   ;;  %s3002_s29 = smov 8  }
   0xe   :  { %42 = dma.hbm_to_vmem [thread:$0]  %s3730_s4, 512, %s37_s26, [#allocation3], %s3001_s28, %s3001_s28, %s3002_s29  }
   0xf   :  { %s3003_s15 = smov [#allocation5]  }
  0x10   :  { %s48_s16 = sshll.u32 %s3003_s15, 4  ;;  %s49_s16 = int_to_ptr.vmem [resolvable:$true] %s48_s16 }
  0x11   :  { %s2940_s17 = scalar_lea.vmem %s49_s16, 5120  ;;  %p2945_p6 = scmp.lt.s32.totalorder %s49_s16, %s49_s16 }
  0x12   :  { %p2941_p5 = scmp.ne.s32.totalorder %s49_s16, %s2940_s17  ;;  %p2946_p7 = scmp.lt.s32.totalorder %s2940_s17, %s2940_s17 }
  0x14   :  { %p2947_p8 = por %p2946_p7, %p2945_p6 }
  0x16   :  { %p2948_p9 = pnand %p2947_p8, %p2941_p5 }
  0x18   :  { %2951 = shalt.err (!%p2948_p9)
}
  0x19   :  { %s3004_s18 = smov 640   ;;  %s3005_s19 = smov 40  }
  0x1a   :  { %54 = dma.hbm_to_vmem [thread:$0]  %s3731_s5, 5120, %s49_s16, [#allocation6], %s3004_s18, %s3004_s18, %s3005_s19  }
  0x1b   :  { %2992 = dma.done.wait [#allocation3], 512  }
  0x1c   :  { %2993 = vsyncadd [#allocation3], 4294966784 }
  0x1d   :  { %2994 = dma.done.wait [#allocation6], 5120  }
  0x1e   :  { %2995 = vsyncadd [#allocation6], 4294962176  ;;  %v3006_v0 = vmov 0.0   ;;  %vm3007_vm0 = vmmov 0   ;;  %vm118_vm1 = vcmask 1043456   ;;  %vm114_vm2 = vcmask 31744  }
  0x1f   :  { %2692 = vmatprep.subr.mxu0 %v3006_v0  ;;  %2694 = vmatprep.mubr.msk.f32.mxu0 %vm3007_vm0, %v3006_v0  ;;  %v107_v1 = vld [vmem:[%s3732_s6] sm:$0xf]  ;;  %v198_v3 = vld [vmem:[%s3733_s7 + $0x18] sm:$0xff]  ;;  %v109_v4 = vlaneseq  ;;  %v197_v5 = vld [vmem:[%s3733_s7 + $0x10] sm:$0xff]  ;;  %vm78_vm3 = vcmask 254976   ;;  %v3008_v15 = vmov 4  }
  0x20   :  { %2697 = vmatprep.subr.mxu1 %v3006_v0  ;;  %2705 = vmatprep.mubr.msk.f32.mxu1 %vm3007_vm0, %v3006_v0  ;;  %v74_v2 = vld [vmem:[%s3728_s2] sm:$0x3]  ;;  %v196_v7 = vld [vmem:[%s3733_s7 + $0x8] sm:$0xff]  ;;  %vm202_vm5 = vcmask 261120   ;;  %v309_v40 = vld [vmem:[%s3734_s8 + $0x18] sm:$0xff]  ;;  %s3010_s14 = smov 119  }
  0x21   :  { %2693 = vmatpush3.msk.msra.mxu0 %vm118_vm1, %v107_v1  ;;  %2698 = vmatpush3.msra.mxu1 %v198_v3  ;;  %v3144_v6 = vshrl.u32 %v109_v4, 7  ;;  %v195_v8 = vld [vmem:[%s3733_s7] sm:$0xff]  ;;  %v276_v19 = vsub.f32 1.0, %v74_v2  ;;  %v308_v42 = vld [vmem:[%s3734_s8 + $0x10] sm:$0xff]  ;;  %v307_v43 = vld [vmem:[%s3734_s8 + $0x8] sm:$0xff]  ;;  %s3011_s15 = smov 78  }
  0x22   :  { %2695 = vmatmul.mubr.msk.f32.vlgmr.msra.gmra.mxu0 %vm114_vm2, %v74_v2  ;;  %2699 = vmatprep.subr.mxu1 %v3006_v0  ;;  %v3158_v10 = vld [vmem:[%s3726_s0] sm:$0x3]  ;;  %s3009_s0 = smov 96   ;;  %v392_v49 = vld [vmem:[%s3735_s9 + $0x18] sm:$0xff]  ;;  %v391_v52 = vld [vmem:[%s3735_s9 + $0x10] sm:$0xff]  ;;  %vm294_vm10 = vcmask 66560  }
  0x23   :  { %2708 = vmatprep.subr.mxu0 %v3006_v0  ;;  %2716 = vmatprep.mubr.msk.f32.mxu0 %vm3007_vm0, %v3006_v0  ;;  %v111_v9 = vsub.s32 0, %v3144_v6  ;;  %v76_v11 = vld [vmem:[%s3727_s1] sm:$0x3]  ;;  %v77_v13 = vmul.f32 %v3158_v10, %v3158_v10  ;;  %v390_v53 = vld [vmem:[%s3735_s9 + $0x8] sm:$0xff]  ;;  %vm516_vm12 = vcmask 523264   ;;  %s3022_s4 = smov 120  }
  0x24   :  { %2700 = vmatpush3.msra.mxu1 %v197_v5  ;;  %v3167_v12 = vld [vmem:[%s3737_s11] sm:$0x3]  ;;  %v92_v14 = vmul.f32 %v76_v11, %v76_v11  ;;  %2880 = vset.pattern.permute.xlu1 %v3008_v15  ;;  %s3023_s5 = smov 124   ;;  %s3024_s22 = smov 112  }
  0x25   :  { %2701 = vmatprep.subr.mxu1 %v3006_v0  ;;  %2881 = vset.pattern.permute.xlu0 %v3008_v15  ;;  %v79_v16 = vsel %vm78_vm3, %v77_v13, 0.0  ;;  %v3174_v17 = vrot.slane %v3167_v12, %v111_v9  ;;  %v306_v46 = vld [vmem:[%s3734_s8] sm:$0xff]  ;;  %v507_v13 = vld [vmem:[#allocation5 + $0xf8] sm:$0xff]  ;;  %s3025_s23 = smov 116   ;;  %s3026_s24 = smov 104  }
  0x26   :  { %2702 = vmatpush3.msra.mxu1 %v196_v7  ;;  %284 = vperm.xlu1 %2880, %v74_v2   ;;  %v93_v18 = vsel %vm78_vm3, %v92_v14, 0.0  ;;  %v389_v56 = vld [vmem:[%s3735_s9] sm:$0xff]  ;;  %s3012_s9 = smov 46   ;;  %v506_v14 = vld [vmem:[#allocation5 + $0xf0] sm:$0xff]  ;;  %s3027_s25 = smov 108   ;;  %vm828_vm3 = vcmask 367616  }
  0x27   :  { %2703 = vmatprep.subr.mxu1 %v3006_v0  ;;  %80 = vadd.xlane.f32.xlu0 %v79_v16  ;;  %v512_v9 = vld [vmem:[#allocation5 + $0x120] sm:$0xff]  ;;  %v502_v16 = vld [vmem:[#allocation5 + $0xd0] sm:$0xff]  ;;  %s3028_s6 = smov 100   ;;  %s3029_s26 = smov 88  }
  0x28   :  { %2704 = vmatpush3.msra.mxu1 %v195_v8  ;;  %2709 = vmatpush3.msra.mxu0 %v309_v40  ;;  %v476_v40 = vld [vmem:[#allocation5] sm:$0xff]  ;;  %s3030_s8 = smov 92   ;;  %s3031_s2 = smov 80  }
  0x29   :  { %2719 = vmatprep.subr.mxu1 %v3006_v0  ;;  %2710 = vmatprep.subr.mxu0 %v3006_v0  ;;  %s3032_s27 = smov 84   ;;  %s3033_s30 = smov 72  }
  0x2a   :  { %199 = vrot.lane.b32.xlu1 %v3174_v17, %s3009_s0  ;;  %2711 = vmatpush3.msra.mxu0 %v308_v42  ;;  %v3226_v42 = vld [vmem:[%s3729_s3] sm:$0x3]  ;;  %s3037_s16 = smov 32   ;;  %s3038_s17 = smov [#allocation8]  }
  0x2b   :  { %94 = vadd.xlane.f32.xlu0 %v93_v18  ;;  %2712 = vmatprep.subr.mxu0 %v3006_v0  ;;  %v501_v18 = vld [vmem:[#allocation5 + $0xc8] sm:$0xff]  ;;  %s2570_s3 = sshll.u32 %s3038_s17, 4  ;;  %s2571_s3 = int_to_ptr.vmem [resolvable:$true] %s2570_s3 }
  0x2c   :  { %2713 = vmatpush3.msra.mxu0 %v307_v43  ;;  %v483_v43 = vld [vmem:[#allocation5 + $0x38] sm:$0xff]  ;;  %s2952_s18 = scalar_lea.vmem %s2571_s3, 512  ;;  %p2957_p11 = scmp.lt.s32.totalorder %s2571_s3, %s2571_s3 }
  0x2d   :  { %2714 = vmatprep.subr.mxu0 %v3006_v0  ;;  %p2953_p10 = scmp.ne.s32.totalorder %s2571_s3, %s2952_s18  ;;  %p2958_p12 = scmp.lt.s32.totalorder %s2952_s18, %s2952_s18 }
  0x2e   :  { %2715 = vmatpush3.msra.mxu0 %v306_v46  ;;  %v515_v46 = vld [vmem:[#allocation5 + $0x138] sm:$0xff] }
  0x2f   :  { %536 = vmatprep.subr.mxu0 %v512_v9  ;;  %p2959_p13 = por %p2958_p12, %p2957_p11 }
  0x31   :  { %p2960_p0 = pnand %p2959_p13, %p2953_p10 }
  0x41   :  { %279 = vperm.xlu0 %2881, %v276_v19   ;;  %v514_v19 = vld [vmem:[#allocation5 + $0x130] sm:$0xff] }
  0xa1   :  { %v285_v48 = vpop.permute.xlu1 %284 }
  0xa5   :  { %v200_v50 = vpop.permute.xlu1 %199 }
  0xb0   :  { %v81_v25 = vpop.xlane.xlu0 %80 }
  0xb1   :  { %2892 = vrsqrt.f32 %v81_v25  ;;  %vm84_vm6 = vcmp.eq.f32.partialorder %v81_v25, inf  ;;  %v87_v31 = vand.u32 2147483648, %v81_v25  ;;  %vm86_vm8 = vcmp.eq.f32.partialorder %v81_v25, 0.0 }
  0xb4   :  { %v95_v26 = vpop.xlane.xlu0 %94 }
  0xb5   :  { %2894 = vrsqrt.f32 %v95_v26  ;;  %vm98_vm7 = vcmp.eq.f32.partialorder %v95_v26, inf  ;;  %v101_v33 = vand.u32 2147483648, %v95_v26  ;;  %vm100_vm9 = vcmp.eq.f32.partialorder %v95_v26, 0.0 }
  0xbc   :  { %v280_v60 = vpop.permute.xlu0 %279 }
  0xbe   :  { %v2893_v27 = vpop.eup %2892 }
  0xbf   :  { %v83_v29 = vmul.f32 %v2893_v27, %v81_v25  ;;  %v503_v27 = vld [vmem:[#allocation5 + $0xd8] sm:$0xff] }
  0xc1   :  { %v85_v32 = vsel %vm84_vm6, %v81_v25, %v83_v29  ;;  %v492_v25 = vld [vmem:[#allocation5 + $0x80] sm:$0xff]  ;;  %v499_v29 = vld [vmem:[#allocation5 + $0xb8] sm:$0xff] }
  0xc2   :  { %v2895_v28 = vpop.eup %2894  ;;  %v88_v35 = vsel %vm86_vm8, %v87_v31, %v85_v32  ;;  %v498_v31 = vld [vmem:[#allocation5 + $0xb0] sm:$0xff] }
  0xc3   :  { %v97_v30 = vmul.f32 %v2895_v28, %v95_v26  ;;  %v89_v37 = vmax.f32 %v88_v35, 1e-12  ;;  %v491_v28 = vld [vmem:[#allocation5 + $0x78] sm:$0xff]  ;;  %v486_v32 = vld [vmem:[#allocation5 + $0x50] sm:$0xff]  ;;  %v493_v35 = vld [vmem:[#allocation5 + $0x88] sm:$0xff] }
  0xc5   :  { %v99_v34 = vsel %vm98_vm7, %v95_v26, %v97_v30  ;;  %2896 = vrcp.f32 %v89_v37  ;;  %v504_v26 = vld [vmem:[#allocation5 + $0xe0] sm:$0xff]  ;;  %v487_v30 = vld [vmem:[#allocation5 + $0x58] sm:$0xff]  ;;  %v489_v37 = vld [vmem:[#allocation5 + $0x68] sm:$0xff] }
  0xc6   :  { %v102_v36 = vsel %vm100_vm9, %v101_v33, %v99_v34  ;;  %v494_v33 = vld [vmem:[#allocation5 + $0x90] sm:$0xff] }
  0xc7   :  { %v103_v38 = vmax.f32 %v102_v36, 1e-12  ;;  %v482_v34 = vld [vmem:[#allocation5 + $0x30] sm:$0xff]  ;;  %v481_v36 = vld [vmem:[#allocation5 + $0x28] sm:$0xff] }
  0xc9   :  { %2898 = vrcp.f32 %v103_v38  ;;  %v477_v38 = vld [vmem:[#allocation5 + $0x8] sm:$0xff] }
  0xd2   :  { %v2897_v39 = vpop.eup %2896 }
  0xd3   :  { %v91_v44 = vmul.f32 %v2897_v39, %v3158_v10  ;;  %v488_v39 = vld [vmem:[#allocation5 + $0x60] sm:$0xff] }
  0xd6   :  { %v2899_v41 = vpop.eup %2898 }
  0xd7   :  { %v105_v45 = vmul.f32 %v2899_v41, %v76_v11  ;;  %v511_v11 = vld [vmem:[#allocation5 + $0x118] sm:$0xff]  ;;  %v484_v41 = vld [vmem:[#allocation5 + $0x40] sm:$0xff] }
  0xd9   :  { %v106_v47 = vsub.f32 %v91_v44, %v105_v45  ;;  %v479_v44 = vld [vmem:[#allocation5 + $0x18] sm:$0xff]  ;;  %v478_v45 = vld [vmem:[#allocation5 + $0x10] sm:$0xff] }
  0xdb   :  { %2717 = vmatmul.mubr.msk.f32.vlgmr.msra.gmra.mxu0 %vm202_vm5, %v106_v47  ;;  %v510_v47 = vld [vmem:[#allocation5 + $0x110] sm:$0xff] }
  0xdc   :  { %584 = vmatprep.mubr.f32.mxu0 %v3006_v0  ;;  %537 = vmatpush1.msra.mxu0 %v511_v11 }
  0xdd   :  { %538 = vmatprep.subr.mxu0 %v507_v13 }
  0xde   :  { %539 = vmatpush1.msra.mxu0 %v506_v14 }
  0xdf   :  { %540 = vmatprep.subr.mxu0 %v502_v16 }
  0xe0   :  { %541 = vmatpush1.msra.mxu0 %v501_v18 }
  0xe2   :  { %v188_v20 = vpop.f32.mrf.mxu0 }
  0xe3   :  { %v189_v21 = vadd.f32 %v188_v20, %v3174_v17  ;;  %v497_v20 = vld [vmem:[#allocation5 + $0xa8] sm:$0xff] }
  0xe4   :  { %v2696_v22 = vpop.f32.mrf.mxu0  ;;  %542 = vmatprep.subr.mxu0 %v497_v20  ;;  %v3016_v20 = vmov 5  }
  0xe5   :  { %vm192_vm4 = vcmp.gt.f32.partialorder %v189_v21, 0.0  ;;  %v193_v23 = vmul.f32 0.2, %v189_v21  ;;  %v509_v22 = vld [vmem:[#allocation5 + $0x108] sm:$0xff] }
  0xe7   :  { %v194_v24 = vsel %vm192_vm4, %v189_v21, %v193_v23  ;;  %v513_v21 = vld [vmem:[#allocation5 + $0x128] sm:$0xff]  ;;  %v496_v23 = vld [vmem:[#allocation5 + $0xa0] sm:$0xff] }
  0xe8   :  { %2706 = vmatmul.mubr.msk.f32.vlgmr.msra.gmra.mxu1 %vm202_vm5, %v194_v24  ;;  %v508_v24 = vld [vmem:[#allocation5 + $0x100] sm:$0xff]  ;;  %543 = vmatpush1.msra.mxu0 %v496_v23 }
  0xe9   :  { %2727 = vmatprep.mubr.msk.f32.mxu1 %vm3007_vm0, %v3006_v0  ;;  %2720 = vmatpush3.msra.mxu1 %v392_v49  ;;  %v505_v49 = vld [vmem:[#allocation5 + $0xe8] sm:$0xff] }
  0xea   :  { %2721 = vmatprep.subr.mxu1 %v3006_v0  ;;  %544 = vmatprep.subr.mxu0 %v492_v25 }
  0xeb   :  { %2722 = vmatpush3.msra.mxu1 %v391_v52  ;;  %545 = vmatpush1.msra.mxu0 %v491_v28  ;;  %v941_v52 = vmul.u32 32, %v3144_v6 }
  0xec   :  { %2723 = vmatprep.subr.mxu1 %v3006_v0  ;;  %546 = vmatprep.subr.mxu0 %v487_v30  ;;  %v819_v30 = vld [vmem:[%s3736_s10 + $0x18] sm:$0xff] }
  0xed   :  { %2724 = vmatpush3.msra.mxu1 %v390_v53  ;;  %547 = vmatpush1.msra.mxu0 %v486_v32  ;;  %v3020_v32 = vmov 8  }
  0xee   :  { %2725 = vmatprep.subr.mxu1 %v3006_v0  ;;  %548 = vmatprep.subr.mxu0 %v482_v34 }
  0xef   :  { %2726 = vmatpush3.msra.mxu1 %v389_v56  ;;  %549 = vmatpush1.msra.mxu0 %v481_v36  ;;  %v485_v56 = vld [vmem:[#allocation5 + $0x48] sm:$0xff] }
  0xf0   :  { %607 = vmatprep.subr.mxu1 %v514_v19  ;;  %550 = vmatprep.subr.mxu0 %v477_v38  ;;  %v3015_v19 = vmov 3  }
  0xf1   :  { %551 = vmatpush1.msra.mxu0 %v476_v40 }
  0xf2   :  { %2592 = vmatmul.mubr.msk.f32.vlgmr.msra.gmra.mxu0 %vm516_vm12, %v3226_v42  ;;  %2730 = vmatprep.subr.mxu0 %v3006_v0 }
  0xf3   :  { %2731 = vmatpush3.msra.mxu0 %v515_v46  ;;  %2746 = vmatprep.mubr.msk.f32.mxu0 %vm3007_vm0, %v3006_v0 }
  0xf4   :  { %2732 = vmatprep.subr.mxu0 %v3006_v0 }
  0xf5   :  { %2733 = vmatpush3.msra.mxu0 %v510_v47 }
  0xf6   :  { %2734 = vmatprep.subr.mxu0 %v3006_v0 }
  0xf7   :  { %2735 = vmatpush3.msra.mxu0 %v505_v49 }
  0xf8   :  { %2736 = vmatprep.subr.mxu0 %v3006_v0 }
 0x19b   :  { %v382_v58 = vpop.f32.mrf.mxu0 }
 0x19d   :  { %v2718_v59 = vpop.f32.mrf.mxu0 }
 0x1a8   :  { %v272_v51 = vpop.f32.mrf.mxu1 }
 0x1a9   :  { %v273_v54 = vadd.f32 %v272_v51, %v200_v50  ;;  %v500_v50 = vld [vmem:[#allocation5 + $0xc0] sm:$0xff]  ;;  %v938_v51 = vand.u32 127, %v109_v4 }
 0x1aa   :  { %v2707_v55 = vpop.f32.mrf.mxu1  ;;  %2737 = vmatpush3.msra.mxu0 %v500_v50  ;;  %v480_v4 = vld [vmem:[#allocation5 + $0x20] sm:$0xff] }
 0x1ab   :  { %v287_v57 = vmul.f32 %v285_v48, %v273_v54  ;;  %v282_v61 = vmul.f32 %v280_v60, %v273_v54  ;;  %v943_v48 = vadd.s32 1, %v3144_v6  ;;  %v495_v54 = vld [vmem:[#allocation5 + $0x98] sm:$0xff]  ;;  %2738 = vmatprep.subr.mxu0 %v3006_v0  ;;  %v490_v55 = vld [vmem:[#allocation5 + $0x70] sm:$0xff]  ;;  %vm942_vm13 = vcmp.ge.s32.totalorder %v938_v51, %v941_v52 }
 0x1ac   :  { %2739 = vmatpush3.msra.mxu0 %v495_v54 }
 0x1ad   :  { %289 = vrot.lane.b32.xlu1 %v287_v57, %s3010_s14  ;;  %v944_v53 = vmul.u32 32, %v943_v48  ;;  %2740 = vmatprep.subr.mxu0 %v3006_v0  ;;  %s3034_s14 = smov 76  }
 0x1ae   :  { %2741 = vmatpush3.msra.mxu0 %v490_v55 }
 0x1af   :  { %vm945_vm14 = vcmp.lt.s32.totalorder %v938_v51, %v944_v53  ;;  %2742 = vmatprep.subr.mxu0 %v3006_v0 }
 0x1b0   :  { %vm946_vm15 = vmand %vm942_vm13, %vm945_vm14  ;;  %2743 = vmatpush3.msra.mxu0 %v485_v56 }
 0x1b1   :  { %310 = vrot.lane.b32.xlu1 %v3174_v17, %s3011_s15  ;;  %2744 = vmatprep.subr.mxu0 %v3006_v0  ;;  %v3249_v57 = vsel %vm946_vm15, 1.0, %v3006_v0  ;;  %s3035_s15 = smov 68  }
 0x1b2   :  { %2745 = vmatpush3.msra.mxu0 %v480_v4  ;;  %v586_v25 = vpop.f32.mrf.mxu0 }
 0x1b3   :  { %2747 = vmatmul.mubr.msk.f32.vlgmr.msra.gmra.mxu0 %vm516_vm12, %v3226_v42  ;;  %2765 = vmatprep.subr.mxu0 %v3006_v0 }
 0x1b4   :  { %2766 = vmatpush3.msk.msra.mxu0 %vm118_vm1, %v3249_v57  ;;  %2767 = vmatprep.mubr.msk.f32.mxu0 %vm3007_vm0, %v3006_v0 }
 0x1b5   :  { %2775 = vmatprep.subr.mxu0 %v3006_v0 }
 0x21f   :  { %v290_v62 = vpop.permute.xlu1 %289 }
 0x220   :  { %v292_v63 = vadd.f32 %v290_v62, %v282_v61 }
 0x222   :  { %v3216_v1 = vmul.f32 10.0, %v292_v63  ;;  %v3013_v63 = vmov 1  }
 0x223   :  { %v311_v2 = vpop.permute.xlu1 %310  ;;  %2882 = vset.pattern.permute.xlu1 %v3013_v63 }
 0x224   :  { %v295_v3 = vsel %vm294_vm10, %v3216_v1, -inf  ;;  %v383_v5 = vadd.f32 %v382_v58, %v311_v2  ;;  %v3014_v2 = vmov 0  }
 0x225   :  { %296 = vmax.xlane.f32.xlu1 %v295_v3  ;;  %2886 = vset.pattern.permute.xlu0 %v3014_v2 }
 0x226   :  { %vm386_vm11 = vcmp.gt.f32.partialorder %v383_v5, 0.0  ;;  %v387_v7 = vmul.f32 0.2, %v383_v5 }
 0x228   :  { %v388_v8 = vsel %vm386_vm11, %v383_v5, %v387_v7 }
 0x229   :  { %2728 = vmatmul.mubr.msk.f32.vlgmr.msra.gmra.mxu1 %vm202_vm5, %v388_v8 }
 0x22a   :  { %655 = vmatprep.mubr.f32.mxu1 %v3006_v0  ;;  %608 = vmatpush1.msra.mxu1 %v513_v21  ;;  %v3017_v21 = vmov 7  }
 0x22b   :  { %609 = vmatprep.subr.mxu1 %v509_v22 }
 0x22c   :  { %610 = vmatpush1.msra.mxu1 %v508_v24  ;;  %v3018_v24 = vmov 2  }
 0x22d   :  { %611 = vmatprep.subr.mxu1 %v504_v26  ;;  %v588_v26 = vpop.f32.mrf.mxu0 }
 0x22e   :  { %612 = vmatpush1.msra.mxu1 %v503_v27 }
 0x22f   :  { %613 = vmatprep.subr.mxu1 %v499_v29  ;;  %v3019_v29 = vmov 6  }
 0x230   :  { %614 = vmatpush1.msra.mxu1 %v498_v31  ;;  %v818_v31 = vld [vmem:[%s3736_s10 + $0x10] sm:$0xff] }
 0x231   :  { %615 = vmatprep.subr.mxu1 %v494_v33  ;;  %v816_v33 = vld [vmem:[%s3736_s10] sm:$0xff] }
 0x232   :  { %616 = vmatpush1.msra.mxu1 %v493_v35 }
 0x233   :  { %617 = vmatprep.subr.mxu1 %v489_v37 }
 0x234   :  { %618 = vmatpush1.msra.mxu1 %v488_v39 }
 0x235   :  { %619 = vmatprep.subr.mxu1 %v484_v41 }
 0x236   :  { %393 = vrot.lane.b32.xlu1 %v3174_v17, %s3012_s9  ;;  %620 = vmatpush1.msra.mxu1 %v483_v43  ;;  %s3036_s9 = smov 45  }
 0x237   :  { %621 = vmatprep.subr.mxu1 %v479_v44 }
 0x238   :  { %622 = vmatpush1.msra.mxu1 %v478_v45 }
 0x239   :  { %2593 = vmatmul.mubr.msk.f32.vlgmr.msra.gmra.mxu1 %vm516_vm12, %v3226_v42  ;;  %2749 = vmatprep.subr.mxu1 %v3006_v0 }
 0x23a   :  { %2757 = vmatprep.mubr.msk.f32.mxu1 %vm3007_vm0, %v3006_v0  ;;  %2750 = vmatpush3.msra.mxu1 %v819_v30 }
 0x23b   :  { %2751 = vmatprep.subr.mxu1 %v3006_v0 }
 0x23c   :  { %2752 = vmatpush3.msra.mxu1 %v818_v31 }
 0x23d   :  { %2753 = vmatprep.subr.mxu1 %v3006_v0 }
 0x273   :  { %v728_v27 = vpop.f32.mrf.mxu0 }
 0x275   :  { %v2748_v28 = vpop.f32.mrf.mxu0 }
 0x2ae   :  { %v297_v58 = vpop.xlane.xlu1 %296 }
 0x2af   :  { %v298_v59 = vsub.f32 %v3216_v1, %v297_v58 }
 0x2b1   :  { %v299_v60 = vmul.f32 1.442695, %v298_v59 }
 0x2b2   :  { %v394_v7 = vpop.permute.xlu1 %393 }
 0x2b3   :  { %2900 = vpow2.f32 %v299_v60 }
 0x2c0   :  { %v2901_v61 = vpop.eup %2900 }
 0x2c1   :  { %v301_v62 = vsel %vm294_vm10, %v2901_v61, 0.0 }
 0x2c2   :  { %302 = vadd.xlane.f32.xlu0 %v301_v62 }
 0x2e9   :  { %v465_v3 = vpop.f32.mrf.mxu1 }
 0x2ea   :  { %v466_v8 = vadd.f32 %v465_v3, %v394_v7 }
 0x2eb   :  { %v2729_v5 = vpop.f32.mrf.mxu1 }
 0x2ec   :  { %v469_v9 = vsub.f32 0.0, %v466_v8 }
 0x2ee   :  { %v470_v11 = vmul.f32 1.442695, %v469_v9 }
 0x34b   :  { %v303_v13 = vpop.xlane.xlu0 %302 }
 0x34c   :  { %2902 = vrcp.f32 %v303_v13 }
 0x34d   :  { %2904 = vpow2.f32 %v470_v11 }
 0x359   :  { %v2903_v1 = vpop.eup %2902 }
 0x35a   :  { %v305_v14 = vmul.f32 %v2903_v1, %v2901_v61  ;;  %v2905_v16 = vpop.eup %2904  ;;  %v822_v1 = vsub.s32 1, %v3144_v6 }
 0x35b   :  { %v472_v18 = vadd.f32 1.0, %v2905_v16 }
 0x35c   :  { %734 = vperm.xlu0 %2886, %v305_v14   ;;  %739 = vperm.xlu1 %2882, %v305_v14  }
 0x35d   :  { %2906 = vrcp.f32 %v472_v18 }
 0x360   :  { %2883 = vset.pattern.permute.xlu1 %v3015_v19 }
 0x361   :  { %755 = vperm.xlu1 %2883, %v305_v14  }
 0x365   :  { %2884 = vset.pattern.permute.xlu1 %v3016_v20 }
 0x366   :  { %771 = vperm.xlu1 %2884, %v305_v14  }
 0x36a   :  { %2885 = vset.pattern.permute.xlu1 %v3017_v21  ;;  %v2907_v22 = vpop.eup %2906 }
 0x36b   :  { %787 = vperm.xlu1 %2885, %v305_v14   ;;  %v808_v23 = vsub.f32 1.0, %v2907_v22 }
 0x36f   :  { %2887 = vset.pattern.permute.xlu1 %v3014_v2 }
 0x370   :  { %804 = vperm.xlu1 %2887, %v2907_v22  }
 0x374   :  { %811 = vperm.xlu1 %2887, %v808_v23  }
 0x378   :  { %2888 = vset.pattern.permute.xlu1 %v3018_v24 }
 0x379   :  { %749 = vperm.xlu1 %2888, %v305_v14  }
 0x37d   :  { %2889 = vset.pattern.permute.xlu1 %v3008_v15  ;;  %v817_v15 = vld [vmem:[%s3736_s10 + $0x8] sm:$0xff]  ;;  %s3021_s10 = smov 64  }
 0x37e   :  { %765 = vperm.xlu1 %2889, %v305_v14   ;;  %2754 = vmatpush3.msra.mxu1 %v817_v15 }
 0x37f   :  { %2755 = vmatprep.subr.mxu1 %v3006_v0 }
 0x380   :  { %2756 = vmatpush3.msra.mxu1 %v816_v33 }
 0x381   :  { %2758 = vmatmul.mubr.msk.f32.vlgmr.msra.gmra.mxu1 %vm202_vm5, %v3158_v10  ;;  %2760 = vmatprep.subr.mxu1 %v3006_v0  ;;  %v657_v10 = vpop.f32.mrf.mxu1 }
 0x382   :  { %2890 = vset.pattern.permute.xlu1 %v3019_v29  ;;  %2761 = vmatpush3.msk.msra.mxu1 %vm118_vm1, %v3249_v57 }
 0x383   :  { %781 = vperm.xlu1 %2890, %v305_v14   ;;  %2762 = vmatprep.mubr.msk.f32.mxu1 %vm3007_vm0, %v3006_v0  ;;  %v659_v40 = vpop.f32.mrf.mxu1 }
 0x384   :  { %2770 = vmatprep.subr.mxu1 %v3006_v0 }
 0x387   :  { %2891 = vset.pattern.permute.xlu1 %v3020_v32 }
 0x388   :  { %797 = vperm.xlu1 %2891, %v305_v14   ;;  %v823_v14 = vrot.slane %v3167_v12, %v822_v1 }
 0x3d7   :  { %v740_v34 = vpop.permute.xlu1 %739  ;;  %v735_v49 = vpop.permute.xlu0 %734 }
 0x3d8   :  { %v742_v35 = vmul.f32 %v740_v34, %v586_v25  ;;  %v737_v51 = vmul.f32 %v735_v49, %v586_v25  ;;  %v3434_v49 = vld [vmem:[#allocation2 + $0x1] sm:$0x1] }
 0x3da   :  { %744 = vrot.lane.b32.xlu1 %v742_v35, %s3021_s10 }
 0x3dc   :  { %v756_v36 = vpop.permute.xlu1 %755 }
 0x3dd   :  { %v758_v37 = vmul.f32 %v756_v36, %v588_v26 }
 0x3df   :  { %760 = vrot.lane.b32.xlu1 %v758_v37, %s3021_s10  ;;  %v3413_v37 = vld [vmem:[#allocation2 + $0x10] sm:$0x1] }
 0x3e1   :  { %v772_v38 = vpop.permute.xlu1 %771 }
 0x3e2   :  { %v774_v39 = vmul.f32 %v772_v38, %v657_v10  ;;  %v3417_v38 = vld [vmem:[#allocation2 + $0x12] sm:$0x1] }
 0x3e4   :  { %776 = vrot.lane.b32.xlu1 %v774_v39, %s3021_s10  ;;  %v3419_v39 = vld [vmem:[#allocation2 + $0x13] sm:$0x1] }
 0x3e6   :  { %v788_v41 = vpop.permute.xlu1 %787 }
 0x3e7   :  { %v790_v43 = vmul.f32 %v788_v41, %v659_v40  ;;  %v3423_v41 = vld [vmem:[#allocation2 + $0x15] sm:$0x1] }
 0x3e9   :  { %792 = vrot.lane.b32.xlu1 %v790_v43, %s3021_s10  ;;  %v3425_v43 = vld [vmem:[#allocation2 + $0x16] sm:$0x1] }
 0x3eb   :  { %v805_v44 = vpop.permute.xlu1 %804 }
 0x3ef   :  { %v812_v45 = vpop.permute.xlu1 %811 }
 0x3f0   :  { %v814_v8 = vmul.f32 %v812_v45, %v3226_v42  ;;  %v3429_v45 = vld [vmem:[#allocation2] sm:$0x1] }
 0x3f4   :  { %v750_v46 = vpop.permute.xlu1 %749 }
 0x3f5   :  { %v752_v53 = vmul.f32 %v750_v46, %v588_v26  ;;  %v1029_v46 = vrot.slane %v3413_v37, 7 }
 0x3f9   :  { %v766_v47 = vpop.permute.xlu1 %765 }
 0x3fa   :  { %v768_v4 = vmul.f32 %v766_v47, %v657_v10  ;;  %v3415_v10 = vld [vmem:[#allocation2 + $0x11] sm:$0x1] }
 0x3fb   :  { %v1129_v47 = vrot.slane %v3415_v10, 7 }
 0x3fe   :  { %v782_v48 = vpop.permute.xlu1 %781 }
 0x3ff   :  { %v784_v61 = vmul.f32 %v782_v48, %v659_v40  ;;  %v3421_v40 = vld [vmem:[#allocation2 + $0x14] sm:$0x1]  ;;  %v1228_v48 = vrot.slane %v3417_v38, 7 }
 0x403   :  { %v798_v50 = vpop.permute.xlu1 %797 }
 0x404   :  { %v800_v3 = vmul.f32 %v798_v50, %v728_v27  ;;  %v1327_v50 = vrot.slane %v3419_v39, 7 }
 0x441   :  { %v3308_v42 = vpop.f32.mrf.mxu1 }
 0x443   :  { %v2759_v13 = vpop.f32.mrf.mxu1 }
 0x44c   :  { %v745_v52 = vpop.permute.xlu1 %744 }
 0x44d   :  { %v747_v54 = vadd.f32 %v745_v52, %v737_v51  ;;  %v1426_v51 = vrot.slane %v3421_v40, 7  ;;  %v1525_v52 = vrot.slane %v3423_v41, 7 }
 0x44f   :  { %v753_v55 = vadd.f32 %v752_v53, %v747_v54  ;;  %v3439_v53 = vld [vmem:[#allocation2 + $0x2] sm:$0x1]  ;;  %v1624_v54 = vrot.slane %v3425_v43, 7 }
 0x451   :  { %v761_v56 = vpop.permute.xlu1 %760 }
 0x452   :  { %v763_v58 = vadd.f32 %v761_v56, %v753_v55  ;;  %v3443_v56 = vld [vmem:[#allocation2 + $0x18] sm:$0x1] }
 0x454   :  { %v769_v59 = vadd.f32 %v768_v4, %v763_v58  ;;  %v3445_v4 = vld [vmem:[#allocation2 + $0x19] sm:$0x1]  ;;  %v3447_v58 = vld [vmem:[#allocation2 + $0x3] sm:$0x1] }
 0x456   :  { %v777_v60 = vpop.permute.xlu1 %776 }
 0x457   :  { %v779_v62 = vadd.f32 %v777_v60, %v769_v59  ;;  %v3449_v59 = vld [vmem:[#allocation2 + $0x4] sm:$0x1]  ;;  %v3451_v60 = vld [vmem:[#allocation2 + $0x5] sm:$0x1] }
 0x459   :  { %v785_v63 = vadd.f32 %v784_v61, %v779_v62  ;;  %v3453_v61 = vld [vmem:[#allocation2 + $0x6] sm:$0x1]  ;;  %v3455_v62 = vld [vmem:[#allocation2 + $0x1a] sm:$0x1] }
 0x45b   :  { %v793_v2 = vpop.permute.xlu1 %792 }
 0x45c   :  { %v795_v5 = vadd.f32 %v793_v2, %v785_v63  ;;  %v3457_v63 = vld [vmem:[#allocation2 + $0x1b] sm:$0x1]  ;;  %v3459_v2 = vld [vmem:[#allocation2 + $0x1c] sm:$0x1] }
 0x45e   :  { %v801_v7 = vadd.f32 %v800_v3, %v795_v5  ;;  %v3461_v3 = vld [vmem:[#allocation2 + $0x7] sm:$0x1]  ;;  %v3463_v5 = vld [vmem:[#allocation2 + $0x8] sm:$0x1] }
 0x460   :  { %v807_v9 = vmul.f32 %v805_v44, %v801_v7  ;;  %v3427_v44 = vld [vmem:[#allocation2 + $0x17] sm:$0x1]  ;;  %v3465_v7 = vld [vmem:[#allocation2 + $0x1d] sm:$0x1] }
 0x461   :  { %v1723_v55 = vrot.slane %v3427_v44, 7 }
 0x462   :  { %v3290_v11 = vadd.f32 %v814_v8, %v807_v9  ;;  %v3467_v8 = vld [vmem:[#allocation2 + $0x1e] sm:$0x1]  ;;  %v3469_v9 = vld [vmem:[#allocation2 + $0x1f] sm:$0x1] }
 0x463   :  { %3747 = vst [vmem:[#allocation15_spill] sm:$0xff] %v3467_v8  ;;  %3748 = vst [vmem:[#allocation16_spill] sm:$0xff] %v3469_v9 }
 0x464   :  { %3746 = vst [vmem:[#allocation14_spill] sm:$0xff] %v3290_v11  ;;  %1152 = vrot.lane.b32.xlu0 %v3290_v11, %s3022_s4  ;;  %1053 = vrot.lane.b32.xlu1 %v3290_v11, %s3023_s5 }
 0x465   :  { %2763 = vmatmul.mubr.msk.f32.vlgmr.msra.gmra.mxu1 %vm114_vm2, %v3290_v11 }
 0x466   :  { %2771 = vmatpush3.msk.msra.mxu1 %vm118_vm1, %v3249_v57  ;;  %2772 = vmatprep.mubr.msk.f32.mxu1 %vm3007_vm0, %v3006_v0 }
 0x467   :  { %2780 = vmatprep.subr.mxu1 %v3006_v0 }
 0x468   :  { %1350 = vrot.lane.b32.xlu0 %v3290_v11, %s3024_s22  ;;  %1251 = vrot.lane.b32.xlu1 %v3290_v11, %s3025_s23 }
 0x46c   :  { %1548 = vrot.lane.b32.xlu0 %v3290_v11, %s3026_s24  ;;  %1449 = vrot.lane.b32.xlu1 %v3290_v11, %s3027_s25 }
 0x470   :  { %1746 = vrot.lane.b32.xlu0 %v3290_v11, %s3009_s0  ;;  %1647 = vrot.lane.b32.xlu1 %v3290_v11, %s3028_s6 }
 0x474   :  { %1944 = vrot.lane.b32.xlu0 %v3290_v11, %s3029_s26  ;;  %1845 = vrot.lane.b32.xlu1 %v3290_v11, %s3030_s8 }
 0x478   :  { %2142 = vrot.lane.b32.xlu0 %v3290_v11, %s3031_s2  ;;  %2043 = vrot.lane.b32.xlu1 %v3290_v11, %s3032_s27 }
 0x47c   :  { %2340 = vrot.lane.b32.xlu0 %v3290_v11, %s3033_s30  ;;  %2241 = vrot.lane.b32.xlu1 %v3290_v11, %s3034_s14 }
 0x480   :  { %2439 = vrot.lane.b32.xlu1 %v3290_v11, %s3035_s15  ;;  %824 = vrot.lane.b32.xlu0 %v3174_v17, %s3036_s9 }
 0x484   :  { %826 = vrot.lane.b32.xlu1 %v823_v14, %s3036_s9 }
 0x4d6   :  { %v1153_v16 = vpop.permute.xlu0 %1152  ;;  %v1054_v18 = vpop.permute.xlu1 %1053 }
 0x4d7   :  { %2768 = vmatmul.mubr.msk.f32.vlgmr.msra.gmra.mxu0 %vm114_vm2, %v1054_v18  ;;  %2773 = vmatmul.mubr.msk.f32.vlgmr.msra.gmra.mxu1 %vm114_vm2, %v1153_v16  ;;  %v1822_v16 = vrot.slane %v3443_v56, 7  ;;  %v3476_v18 = vld [vmem:[#allocation2 + $0x9] sm:$0x1] }
 0x4d8   :  { %2776 = vmatpush3.msk.msra.mxu0 %vm118_vm1, %v3249_v57  ;;  %2777 = vmatprep.mubr.msk.f32.mxu0 %vm3007_vm0, %v3006_v0 }
 0x4d9   :  { %2781 = vmatpush3.msk.msra.mxu1 %vm118_vm1, %v3249_v57  ;;  %2782 = vmatprep.mubr.msk.f32.mxu1 %vm3007_vm0, %v3006_v0 }
 0x4da   :  { %v1351_v6 = vpop.permute.xlu0 %1350  ;;  %v1252_v12 = vpop.permute.xlu1 %1251  ;;  %2785 = vmatprep.subr.mxu0 %v3006_v0  ;;  %2790 = vmatprep.subr.mxu1 %v3006_v0 }
 0x4db   :  { %2778 = vmatmul.mubr.msk.f32.vlgmr.msra.gmra.mxu0 %vm114_vm2, %v1252_v12  ;;  %2783 = vmatmul.mubr.msk.f32.vlgmr.msra.gmra.mxu1 %vm114_vm2, %v1351_v6  ;;  %v1921_v6 = vrot.slane %v3445_v4, 7  ;;  %v3479_v12 = vld [vmem:[#allocation2 + $0xa] sm:$0x1] }
 0x4dc   :  { %2786 = vmatpush3.msk.msra.mxu0 %vm118_vm1, %v3249_v57  ;;  %2787 = vmatprep.mubr.msk.f32.mxu0 %vm3007_vm0, %v3006_v0 }
 0x4dd   :  { %2791 = vmatpush3.msk.msra.mxu1 %vm118_vm1, %v3249_v57  ;;  %2792 = vmatprep.mubr.msk.f32.mxu1 %vm3007_vm0, %v3006_v0 }
 0x4de   :  { %v1549_v17 = vpop.permute.xlu0 %1548  ;;  %v1450_v19 = vpop.permute.xlu1 %1449  ;;  %2795 = vmatprep.subr.mxu0 %v3006_v0  ;;  %2800 = vmatprep.subr.mxu1 %v3006_v0 }
 0x4df   :  { %2788 = vmatmul.mubr.msk.f32.vlgmr.msra.gmra.mxu0 %vm114_vm2, %v1450_v19  ;;  %2793 = vmatmul.mubr.msk.f32.vlgmr.msra.gmra.mxu1 %vm114_vm2, %v1549_v17  ;;  %v2020_v19 = vrot.slane %v3455_v62, 7 }
 0x4e0   :  { %2796 = vmatpush3.msk.msra.mxu0 %vm118_vm1, %v3249_v57  ;;  %2797 = vmatprep.mubr.msk.f32.mxu0 %vm3007_vm0, %v3006_v0 }
 0x4e1   :  { %2801 = vmatpush3.msk.msra.mxu1 %vm118_vm1, %v3249_v57  ;;  %2802 = vmatprep.mubr.msk.f32.mxu1 %vm3007_vm0, %v3006_v0 }
 0x4e2   :  { %v1747_v20 = vpop.permute.xlu0 %1746  ;;  %v1648_v21 = vpop.permute.xlu1 %1647  ;;  %2805 = vmatprep.subr.mxu0 %v3006_v0  ;;  %2810 = vmatprep.subr.mxu1 %v3006_v0 }
 0x4e3   :  { %2798 = vmatmul.mubr.msk.f32.vlgmr.msra.gmra.mxu0 %vm114_vm2, %v1648_v21  ;;  %2803 = vmatmul.mubr.msk.f32.vlgmr.msra.gmra.mxu1 %vm114_vm2, %v1747_v20  ;;  %v3483_v20 = vld [vmem:[#allocation2 + $0xb] sm:$0x1]  ;;  %v2119_v21 = vrot.slane %v3457_v63, 7 }
 0x4e4   :  { %2806 = vmatpush3.msk.msra.mxu0 %vm118_vm1, %v3249_v57  ;;  %2807 = vmatprep.mubr.msk.f32.mxu0 %vm3007_vm0, %v3006_v0 }
 0x4e5   :  { %2811 = vmatpush3.msk.msra.mxu1 %vm118_vm1, %v3249_v57  ;;  %2812 = vmatprep.mubr.msk.f32.mxu1 %vm3007_vm0, %v3006_v0 }
 0x4e6   :  { %v1945_v22 = vpop.permute.xlu0 %1944  ;;  %v1846_v23 = vpop.permute.xlu1 %1845  ;;  %2815 = vmatprep.subr.mxu0 %v3006_v0  ;;  %2820 = vmatprep.subr.mxu1 %v3006_v0 }
 0x4e7   :  { %2808 = vmatmul.mubr.msk.f32.vlgmr.msra.gmra.mxu0 %vm114_vm2, %v1846_v23  ;;  %2813 = vmatmul.mubr.msk.f32.vlgmr.msra.gmra.mxu1 %vm114_vm2, %v1945_v22  ;;  %v2218_v22 = vrot.slane %v3459_v2, 7 }
 0x4e8   :  { %2816 = vmatpush3.msk.msra.mxu0 %vm118_vm1, %v3249_v57  ;;  %2817 = vmatprep.mubr.msk.f32.mxu0 %vm3007_vm0, %v3006_v0 }
 0x4e9   :  { %2821 = vmatpush3.msk.msra.mxu1 %vm118_vm1, %v3249_v57  ;;  %2822 = vmatprep.mubr.msk.f32.mxu1 %vm3007_vm0, %v3006_v0 }
 0x4ea   :  { %v2143_v24 = vpop.permute.xlu0 %2142  ;;  %v2044_v25 = vpop.permute.xlu1 %2043  ;;  %2825 = vmatprep.subr.mxu0 %v3006_v0  ;;  %2830 = vmatprep.subr.mxu1 %v3006_v0 }
 0x4eb   :  { %2818 = vmatmul.mubr.msk.f32.vlgmr.msra.gmra.mxu0 %vm114_vm2, %v2044_v25  ;;  %2823 = vmatmul.mubr.msk.f32.vlgmr.msra.gmra.mxu1 %vm114_vm2, %v2143_v24  ;;  %v3489_v24 = vld [vmem:[#allocation2 + $0xc] sm:$0x1]  ;;  %v2317_v25 = vrot.slane %v3465_v7, 7 }
 0x4ec   :  { %2826 = vmatpush3.msk.msra.mxu0 %vm118_vm1, %v3249_v57  ;;  %2827 = vmatprep.mubr.msk.f32.mxu0 %vm3007_vm0, %v3006_v0 }
 0x4ed   :  { %2831 = vmatpush3.msk.msra.mxu1 %vm118_vm1, %v3249_v57  ;;  %2832 = vmatprep.mubr.msk.f32.mxu1 %vm3007_vm0, %v3006_v0 }
 0x4ee   :  { %v2341_v26 = vpop.permute.xlu0 %2340  ;;  %v2242_v27 = vpop.permute.xlu1 %2241  ;;  %2835 = vmatprep.subr.mxu0 %v3006_v0 }
 0x4ef   :  { %2828 = vmatmul.mubr.msk.f32.vlgmr.msra.gmra.mxu0 %vm114_vm2, %v2242_v27  ;;  %2833 = vmatmul.mubr.msk.f32.vlgmr.msra.gmra.mxu1 %vm114_vm2, %v2341_v26  ;;  %v2416_v26 = vrot.slane %v3467_v8, 7  ;;  %v2515_v27 = vrot.slane %v3469_v9, 7 }
 0x4f0   :  { %2836 = vmatpush3.msk.msra.mxu0 %vm118_vm1, %v3249_v57  ;;  %2837 = vmatprep.mubr.msk.f32.mxu0 %vm3007_vm0, %v3006_v0  ;;  %vm922_vm0 = vcmask 785408   ;;  %vm1030_vm1 = vcmask 1041409  }
 0x4f1   :  { %v1031_v1 = vsel %vm1030_vm1, %v1029_v46, %v3429_v45  ;;  %v1130_v14 = vsel %vm1030_vm1, %v1129_v47, %v3434_v49  ;;  %v1229_v23 = vsel %vm1030_vm1, %v1228_v48, %v3439_v53  ;;  %v1724_v46 = vsel %vm1030_vm1, %v1723_v55, %v3461_v3 }
 0x4f2   :  { %v2440_v28 = vpop.permute.xlu1 %2439  ;;  %v825_v29 = vpop.permute.xlu0 %824  ;;  %v1823_v47 = vsel %vm1030_vm1, %v1822_v16, %v3463_v5  ;;  %v1922_v48 = vsel %vm1030_vm1, %v1921_v6, %v3476_v18 }
 0x4f3   :  { %2838 = vmatmul.mubr.msk.f32.vlgmr.msra.gmra.mxu0 %vm114_vm2, %v2440_v28  ;;  %v1328_v28 = vsel %vm1030_vm1, %v1327_v50, %v3447_v58 }
 0x4f6   :  { %v827_v30 = vpop.permute.xlu1 %826 }
 0x4f7   :  { %v829_v31 = vsel %vm828_vm3, %v825_v29, %v827_v30  ;;  %v1427_v29 = vsel %vm1030_vm1, %v1426_v51, %v3449_v59  ;;  %v1526_v30 = vsel %vm1030_vm1, %v1525_v52, %v3451_v60  ;;  %v2021_v51 = vsel %vm1030_vm1, %v2020_v19, %v3479_v12 }
 0x4f8   :  { %v3399_v15 = vadd.f32 %v3308_v42, %v829_v31  ;;  %v1625_v31 = vsel %vm1030_vm1, %v1624_v54, %v3453_v61  ;;  %v2120_v52 = vsel %vm1030_vm1, %v2119_v21, %v3483_v20  ;;  %v2219_v54 = vsel %vm1030_vm1, %v2218_v22, %v3489_v24 }
 0x4fa   :  { %v904_v32 = vsub.f32 0.0, %v3399_v15 }
 0x4fc   :  { %v905_v33 = vmul.f32 1.442695, %v904_v32  ;;  %v3502_v32 = vld [vmem:[#allocation2 + $0xd] sm:$0x1] }
 0x4fe   :  { %2908 = vpow2.f32 %v905_v33  ;;  %v3504_v33 = vld [vmem:[#allocation2 + $0xe] sm:$0x1] }
 0x4ff   :  { %3749 = vst [vmem:[#allocation17_spill] sm:$0xff] %v3504_v33 }
 0x50b   :  { %v2909_v34 = vpop.eup %2908 }
 0x50c   :  { %v907_v35 = vadd.f32 1.0, %v2909_v34  ;;  %v3506_v34 = vld [vmem:[#allocation2 + $0xf] sm:$0x1] }
 0x50d   :  { %3750 = vst [vmem:[#allocation18_spill] sm:$0xff] %v3506_v34  ;;  %v3535_v16 = vsel %vm1030_vm1, %v2515_v27, %v3506_v34 }
 0x50e   :  { %2910 = vrcp.f32 %v907_v35 }
 0x51b   :  { %v2911_v57 = vpop.eup %2910 }
 0x51c   :  { %914 = vrot.lane.b32.xlu1 %v2911_v57, %s3021_s10  ;;  %911 = vrot.lane.b32.xlu0 %v2911_v57, %s3037_s16 }
 0x520   :  { %925 = vrot.lane.b32.xlu1 %v3399_v15, %s3009_s0  ;;  %917 = vrot.lane.b32.xlu0 %v2911_v57, %s3009_s0 }
 0x524   :  { %931 = vrot.lane.b32.xlu1 %v3399_v15, %s3021_s10  ;;  %928 = vrot.lane.b32.xlu0 %v3399_v15, %s3037_s16 }
 0x525   :  { %v3411_v0 = vpop.f32.mrf.mxu1 }
 0x527   :  { %v2764_v36 = vpop.f32.mrf.mxu1 }
 0x58e   :  { %v915_v42 = vpop.permute.xlu1 %914  ;;  %v912_v13 = vpop.permute.xlu0 %911 }
 0x58f   :  { %v920_v17 = vsel %vm202_vm5, %v2911_v57, %v912_v13  ;;  %v2417_v13 = vsel %vm1030_vm1, %v2416_v26, %v3504_v33 }
 0x590   :  { %v921_v35 = vsel %vm516_vm12, %v920_v17, %v915_v42  ;;  %v2318_v42 = vsel %vm1030_vm1, %v2317_v25, %v3502_v32 }
 0x592   :  { %v3509_v57 = vpop.permute.xlu1 %925  ;;  %v918_v36 = vpop.permute.xlu0 %917 }
 0x593   :  { %3751 = vst [vmem:[#allocation19_spill] sm:$0xff] %v3509_v57  ;;  %v3518_v50 = vsel %vm922_vm0, %v921_v35, %v918_v36  ;;  %v934_v55 = vsel %vm202_vm5, %v3509_v57, %v3399_v15 }
 0x594   :  { %v1033_v6 = vmul.f32 %v1031_v1, %v3518_v50  ;;  %v1132_v17 = vmul.f32 %v1130_v14, %v3518_v50  ;;  %v1231_v19 = vmul.f32 %v1229_v23, %v3518_v50  ;;  %v1330_v21 = vmul.f32 %v1328_v28, %v3518_v50 }
 0x595   :  { %v1429_v35 = vmul.f32 %v1427_v29, %v3518_v50  ;;  %v1528_v25 = vmul.f32 %v1526_v30, %v3518_v50  ;;  %v1627_v26 = vmul.f32 %v1625_v31, %v3518_v50  ;;  %v3545_v36 = vmul.f32 %v1724_v46, %v3518_v50 }
 0x596   :  { %v932_v22 = vpop.permute.xlu1 %931  ;;  %v929_v15 = vpop.permute.xlu0 %928  ;;  %v3553_v23 = vmul.f32 %v1823_v47, %v3518_v50  ;;  %v3556_v28 = vmul.f32 %v1922_v48, %v3518_v50  ;;  %v3559_v29 = vmul.f32 %v2021_v51, %v3518_v50  ;;  %v3565_v31 = vmul.f32 %v2120_v52, %v3518_v50 }
 0x597   :  { %v935_v27 = vsel %vm516_vm12, %v934_v55, %v929_v15  ;;  %v3548_v1 = vpop.f32.mrf.mxu0  ;;  %v3550_v14 = vpop.f32.mrf.mxu1  ;;  %v3568_v46 = vmul.f32 %v2219_v54, %v3518_v50  ;;  %v3571_v55 = vmul.f32 %v2318_v42, %v3518_v50  ;;  %v3581_v11 = vmul.f32 %v2417_v13, %v3518_v50 }
 0x598   :  { %v3562_v30 = vsel %vm922_vm0, %v935_v27, %v932_v22 }
 0x599   :  { %v1034_v47 = vsub.f32 %v3562_v30, %v1033_v6  ;;  %v1133_v48 = vsub.f32 %v3562_v30, %v1132_v17  ;;  %v1232_v15 = vsub.f32 %v3562_v30, %v1231_v19  ;;  %v2769_v51 = vpop.f32.mrf.mxu0  ;;  %v2774_v57 = vpop.f32.mrf.mxu1  ;;  %v1331_v22 = vsub.f32 %v3562_v30, %v1330_v21 }
 0x59a   :  { %v1430_v27 = vsub.f32 %v3562_v30, %v1429_v35  ;;  %v1529_v52 = vsub.f32 %v3562_v30, %v1528_v25  ;;  %v1628_v54 = vsub.f32 %v3562_v30, %v1627_v26 }
 0x59b   :  { %v1035_v42 = vmul.f32 %v1034_v47, %v3411_v0  ;;  %v1134_v6 = vmul.f32 %v1133_v48, %v3548_v1  ;;  %v1233_v17 = vmul.f32 %v1232_v15, %v3550_v14  ;;  %v3586_v19 = vpop.f32.mrf.mxu0  ;;  %v3588_v57 = vpop.f32.mrf.mxu1 }
 0x59c   :  { %v1332_v35 = vmul.f32 %v1331_v22, %v3586_v19  ;;  %v1431_v25 = vmul.f32 %v1430_v27, %v3588_v57 }
 0x59d   :  { %v1037_v47 = vrot.slane %v1035_v42, 1  ;;  %v1040_v48 = vadd.f32 %v1035_v42, %v3429_v45  ;;  %v1136_v15 = vrot.slane %v1134_v6, 1  ;;  %v1139_v51 = vadd.f32 %v1134_v6, %v3434_v49  ;;  %v2779_v9 = vpop.f32.mrf.mxu0  ;;  %v2784_v8 = vpop.f32.mrf.mxu1 }
 0x59e   :  { %v1235_v34 = vrot.slane %v1233_v17, 1  ;;  %v1238_v21 = vadd.f32 %v1233_v17, %v3439_v53  ;;  %v1334_v22 = vrot.slane %v1332_v35, 1  ;;  %v1337_v27 = vadd.f32 %v1332_v35, %v3447_v58 }
 0x59f   :  { %v1041_v33 = vadd.f32 %v1037_v47, %v3413_v37  ;;  %1042 = vst [vmem:[#allocation8] sm:$0x1] %v1040_v48  ;;  %v1140_v13 = vadd.f32 %v1136_v15, %v3415_v10  ;;  %1141 = vst [vmem:[#allocation8 + $0x1] sm:$0x1] %v1139_v51  ;;  %v1433_v26 = vrot.slane %v1431_v25, 1  ;;  %v1436_v45 = vadd.f32 %v1431_v25, %v3449_v59  ;;  %v3605_v42 = vpop.f32.mrf.mxu0  ;;  %v3607_v49 = vpop.f32.mrf.mxu1 }
 0x5a0   :  { %v1239_v8 = vadd.f32 %v1235_v34, %v3417_v38  ;;  %1240 = vst [vmem:[#allocation8 + $0x2] sm:$0x1] %v1238_v21  ;;  %v1338_v53 = vadd.f32 %v1334_v22, %v3419_v39  ;;  %1339 = vst [vmem:[#allocation8 + $0x3] sm:$0x1] %v1337_v27  ;;  %v1530_v58 = vmul.f32 %v1529_v52, %v3605_v42 }
 0x5a1   :  { %v1629_v37 = vmul.f32 %v1628_v54, %v3607_v49  ;;  %1043 = vst [vmem:[#allocation8 + $0x10] sm:$0x1] %v1041_v33  ;;  %v1046_v10 = vrot.slane %v1041_v33, 7  ;;  %1142 = vst [vmem:[#allocation8 + $0x11] sm:$0x1] %v1140_v13  ;;  %v1145_v9 = vrot.slane %v1140_v13, 7  ;;  %v1437_v59 = vadd.f32 %v1433_v26, %v3421_v40  ;;  %v2789_v6 = vpop.f32.mrf.mxu0  ;;  %v2794_v17 = vpop.f32.mrf.mxu1 }
 0x5a2   :  { %1438 = vst [vmem:[#allocation8 + $0x4] sm:$0x1] %v1436_v45  ;;  %v2024_v38 = vsub.f32 %v3562_v30, %v3559_v29  ;;  %1241 = vst [vmem:[#allocation8 + $0x12] sm:$0x1] %v1239_v8  ;;  %v1244_v34 = vrot.slane %v1239_v8, 7  ;;  %v1343_v39 = vrot.slane %v1338_v53, 7  ;;  %v1535_v52 = vadd.f32 %v1530_v58, %v3451_v60 }
 0x5a3   :  { %1340 = vst [vmem:[#allocation8 + $0x13] sm:$0x1] %v1338_v53  ;;  %v1532_v35 = vrot.slane %v1530_v58, 1  ;;  %v1047_v54 = vsel %vm1030_vm1, %v1046_v10, %v1040_v48  ;;  %v1146_v33 = vsel %vm1030_vm1, %v1145_v9, %v1139_v51  ;;  %1439 = vst [vmem:[#allocation8 + $0x14] sm:$0x1] %v1437_v59  ;;  %v1442_v25 = vrot.slane %v1437_v59, 7  ;;  %v3619_v13 = vpop.f32.mrf.mxu0  ;;  %v3621_v26 = vpop.f32.mrf.mxu1 }
 0x5a4   :  { %v1631_v40 = vrot.slane %v1629_v37, 1  ;;  %v1049_v29 = vmul.f32 %v1047_v54, %v3411_v0  ;;  %v1148_v47 = vmul.f32 %v1146_v33, %v3548_v1  ;;  %v1245_v15 = vsel %vm1030_vm1, %v1244_v34, %v1238_v21  ;;  %1537 = vst [vmem:[#allocation8 + $0x5] sm:$0x1] %v1535_v52 }
 0x5a5   :  { %v1344_v22 = vsel %vm1030_vm1, %v1343_v39, %v1337_v27  ;;  %v1247_v60 = vmul.f32 %v1245_v15, %v3550_v14  ;;  %v1443_v48 = vsel %vm1030_vm1, %v1442_v25, %v1436_v45  ;;  %v1536_v51 = vadd.f32 %v1532_v35, %v3423_v41  ;;  %v2799_v8 = vpop.f32.mrf.mxu0  ;;  %v2804_v53 = vpop.f32.mrf.mxu1 }
 0x5a6   :  { %v2123_v58 = vsub.f32 %v3562_v30, %v3565_v31  ;;  %v1149_v10 = vadd.f32 %v1148_v47, %v1049_v29  ;;  %v1346_v0 = vmul.f32 %v1344_v22, %v3586_v19  ;;  %v1634_v1 = vadd.f32 %v1629_v37, %v3453_v61 }
 0x5a7   :  { %v1635_v21 = vadd.f32 %v1631_v40, %v3425_v43  ;;  %v1445_v27 = vmul.f32 %v1443_v48, %v3588_v57  ;;  %1538 = vst [vmem:[#allocation8 + $0x15] sm:$0x1] %v1536_v51  ;;  %v1541_v14 = vrot.slane %v1536_v51, 7  ;;  %v3752_v41 = vsub.f32 %v3562_v30, %v3545_v36  ;;  %v3644_v59 = vpop.f32.mrf.mxu0  ;;  %v3646_v19 = vpop.f32.mrf.mxu1 }
 0x5a8   :  { %v3753_v31 = vsub.f32 %v3562_v30, %v3553_v23  ;;  %v1248_v61 = vadd.f32 %v1247_v60, %v1149_v10  ;;  %1636 = vst [vmem:[#allocation8 + $0x6] sm:$0x1] %v1634_v1  ;;  %v3754_v57 = vsub.f32 %v3562_v30, %v3556_v28  ;;  %v2025_v36 = vmul.f32 %v2024_v38, %v3646_v19 }
 0x5a9   :  { %v1728_v45 = vmul.f32 %v3752_v41, %v3619_v13  ;;  %1637 = vst [vmem:[#allocation8 + $0x16] sm:$0x1] %v1635_v21  ;;  %v1640_v43 = vrot.slane %v1635_v21, 7  ;;  %v1542_v6 = vsel %vm1030_vm1, %v1541_v14, %v1535_v52  ;;  %v2809_v39 = vpop.f32.mrf.mxu0  ;;  %v2814_v35 = vpop.f32.mrf.mxu1  ;;  %v2222_v40 = vsub.f32 %v3562_v30, %v3568_v46 }
 0x5aa   :  { %v1827_v9 = vmul.f32 %v3753_v31, %v3621_v26  ;;  %v1926_v37 = vmul.f32 %v3754_v57, %v3644_v59  ;;  %v1347_v54 = vadd.f32 %v1346_v0, %v1248_v61  ;;  %v1544_v33 = vmul.f32 %v1542_v6, %v3605_v42 }
 0x5ab   :  { %v1730_v17 = vrot.slane %v1728_v45, 1  ;;  %v1733_v23 = vadd.f32 %v1728_v45, %v3461_v3  ;;  %v1641_v28 = vsel %vm1030_vm1, %v1640_v43, %v1634_v1  ;;  %v3662_v3 = vpop.f32.mrf.mxu0  ;;  %v3664_v47 = vpop.f32.mrf.mxu1  ;;  %v2030_v22 = vadd.f32 %v2025_v36, %v3479_v12 }
 0x5ac   :  { %v1829_v34 = vrot.slane %v1827_v9, 1  ;;  %v1832_v25 = vadd.f32 %v1827_v9, %v3463_v5  ;;  %v1928_v29 = vrot.slane %v1926_v37, 1  ;;  %v1446_v15 = vadd.f32 %v1445_v27, %v1347_v54 }
 0x5ad   :  { %v1734_v38 = vadd.f32 %v1730_v17, %v3427_v44  ;;  %1735 = vst [vmem:[#allocation8 + $0x7] sm:$0x1] %v1733_v23  ;;  %v1931_v42 = vadd.f32 %v1926_v37, %v3476_v18  ;;  %v2027_v5 = vrot.slane %v2025_v36, 1  ;;  %v2819_v48 = vpop.f32.mrf.mxu0  ;;  %v2824_v51 = vpop.f32.mrf.mxu1  ;;  %v1643_v53 = vmul.f32 %v1641_v28, %v3607_v49  ;;  %2032 = vst [vmem:[#allocation8 + $0xa] sm:$0x1] %v2030_v22 }
 0x5ae   :  { %v1833_v52 = vadd.f32 %v1829_v34, %v3443_v56  ;;  %1834 = vst [vmem:[#allocation8 + $0x8] sm:$0x1] %v1832_v25  ;;  %v1932_v44 = vadd.f32 %v1928_v29, %v3445_v4  ;;  %v2124_v56 = vmul.f32 %v2123_v58, %v3662_v3  ;;  %v1545_v8 = vadd.f32 %v1544_v33, %v1446_v15 }
 0x5af   :  { %1736 = vst [vmem:[#allocation8 + $0x17] sm:$0x1] %v1734_v38  ;;  %v1739_v46 = vrot.slane %v1734_v38, 7  ;;  %1933 = vst [vmem:[#allocation8 + $0x9] sm:$0x1] %v1931_v42  ;;  %v2031_v10 = vadd.f32 %v2027_v5, %v3455_v62  ;;  %v2223_v18 = vmul.f32 %v2222_v40, %v3664_v47  ;;  %v2311_v21 = vpop.f32.mrf.mxu0  ;;  %v3675_v58 = vpop.f32.mrf.mxu1  ;;  %v2321_v62 = vsub.f32 %v3562_v30, %v3571_v55 }
 0x5b0   :  { %1835 = vst [vmem:[#allocation8 + $0x18] sm:$0x1] %v1833_v52  ;;  %v1838_v60 = vrot.slane %v1833_v52, 7  ;;  %1934 = vst [vmem:[#allocation8 + $0x19] sm:$0x1] %v1932_v44  ;;  %v1937_v1 = vrot.slane %v1932_v44, 7  ;;  %v1644_v27 = vadd.f32 %v1643_v53, %v1545_v8  ;;  %v2129_v45 = vadd.f32 %v2124_v56, %v3483_v20 }
 0x5b1   :  { %v1740_v12 = vsel %vm1030_vm1, %v1739_v46, %v1733_v23  ;;  %v2126_v4 = vrot.slane %v2124_v56, 1  ;;  %2033 = vst [vmem:[#allocation8 + $0x1a] sm:$0x1] %v2031_v10  ;;  %v2036_v49 = vrot.slane %v2031_v10, 7  ;;  %v2225_v9 = vrot.slane %v2223_v18, 1  ;;  %v2829_v61 = vpop.f32.mrf.mxu0  ;;  %v2834_v43 = vpop.f32.mrf.mxu1  ;;  %v3755_v52 = vld [vmem:[#allocation17_spill] sm:$0xff] }
 0x5b2   :  { %v1839_v0 = vsel %vm1030_vm1, %v1838_v60, %v1832_v25  ;;  %v1742_v14 = vmul.f32 %v1740_v12, %v3619_v13  ;;  %v1938_v41 = vsel %vm1030_vm1, %v1937_v1, %v1931_v42  ;;  %v2228_v36 = vadd.f32 %v2223_v18, %v3489_v24  ;;  %2131 = vst [vmem:[#allocation8 + $0xb] sm:$0x1] %v2129_v45  ;;  %v3756_v42 = vld [vmem:[#allocation18_spill] sm:$0xff]  ;;  %v3757_v46 = vld [vmem:[#allocation15_spill] sm:$0xff]  ;;  %v3758_v44 = vld [vmem:[#allocation16_spill] sm:$0xff] }
 0x5b3   :  { %v2130_v31 = vadd.f32 %v2126_v4, %v3457_v63  ;;  %v1841_v37 = vmul.f32 %v1839_v0, %v3621_v26  ;;  %v2518_v13 = vmul.f32 %v3535_v16, %v3518_v50  ;;  %v2037_v6 = vsel %vm1030_vm1, %v2036_v49, %v2030_v22  ;;  %v2509_v63 = vpop.f32.mrf.mxu0 }
 0x5b4   :  { %v1743_v57 = vadd.f32 %v1742_v14, %v1644_v27  ;;  %v2229_v20 = vadd.f32 %v2225_v9, %v3459_v2  ;;  %v2322_v17 = vmul.f32 %v2321_v62, %v2311_v21  ;;  %v1940_v34 = vmul.f32 %v1938_v41, %v3644_v59  ;;  %2230 = vst [vmem:[#allocation8 + $0xc] sm:$0x1] %v2228_v36 }
 0x5b5   :  { %2132 = vst [vmem:[#allocation8 + $0x1b] sm:$0x1] %v2130_v31  ;;  %v2135_v55 = vrot.slane %v2130_v31, 7  ;;  %v2420_v26 = vsub.f32 %v3562_v30, %v3581_v11  ;;  %v2519_v24 = vsub.f32 %v3562_v30, %v2518_v13  ;;  %v2839_v54 = vpop.f32.mrf.mxu0  ;;  %v2039_v33 = vmul.f32 %v2037_v6, %v3646_v19 }
 0x5b6   :  { %v1842_v23 = vadd.f32 %v1841_v37, %v1743_v57  ;;  %2231 = vst [vmem:[#allocation8 + $0x1c] sm:$0x1] %v2229_v20  ;;  %v2234_v16 = vrot.slane %v2229_v20, 7  ;;  %v2324_v39 = vrot.slane %v2322_v17, 1  ;;  %v2327_v35 = vadd.f32 %v2322_v17, %v3502_v32 }
 0x5b7   :  { %v2136_v50 = vsel %vm1030_vm1, %v2135_v55, %v2129_v45  ;;  %v2421_v25 = vmul.f32 %v2420_v26, %v3675_v58  ;;  %v2520_v59 = vmul.f32 %v2519_v24, %v2509_v63 }
 0x5b8   :  { %v1941_v2 = vadd.f32 %v1940_v34, %v1842_v23  ;;  %v2235_v40 = vsel %vm1030_vm1, %v2234_v16, %v2228_v36  ;;  %v2328_v11 = vadd.f32 %v2324_v39, %v3465_v7  ;;  %2329 = vst [vmem:[#allocation8 + $0xd] sm:$0x1] %v2327_v35  ;;  %v2138_v28 = vmul.f32 %v2136_v50, %v3662_v3 }
 0x5b9   :  { %v2423_v38 = vrot.slane %v2421_v25, 1  ;;  %v2426_v29 = vadd.f32 %v2421_v25, %v3755_v52  ;;  %v2522_v15 = vrot.slane %v2520_v59, 1  ;;  %v2525_v5 = vadd.f32 %v2520_v59, %v3756_v42 }
 0x5ba   :  { %v2040_v30 = vadd.f32 %v2039_v33, %v1941_v2  ;;  %2330 = vst [vmem:[#allocation8 + $0x1d] sm:$0x1] %v2328_v11  ;;  %v2333_v32 = vrot.slane %v2328_v11, 7  ;;  %v2237_v22 = vmul.f32 %v2235_v40, %v3664_v47 }
 0x5bb   :  { %v2427_v60 = vadd.f32 %v2423_v38, %v3757_v46  ;;  %2428 = vst [vmem:[#allocation8 + $0xe] sm:$0x1] %v2426_v29  ;;  %v2526_v56 = vadd.f32 %v2522_v15, %v3758_v44  ;;  %2527 = vst [vmem:[#allocation8 + $0xf] sm:$0x1] %v2525_v5 }
 0x5bc   :  { %v2139_v19 = vadd.f32 %v2138_v28, %v2040_v30  ;;  %v2334_v7 = vsel %vm1030_vm1, %v2333_v32, %v2327_v35 }
 0x5bd   :  { %v2336_v48 = vmul.f32 %v2334_v7, %v2311_v21  ;;  %2429 = vst [vmem:[#allocation8 + $0x1e] sm:$0x1] %v2427_v60  ;;  %v2432_v51 = vrot.slane %v2427_v60, 7  ;;  %2528 = vst [vmem:[#allocation8 + $0x1f] sm:$0x1] %v2526_v56  ;;  %v2531_v8 = vrot.slane %v2526_v56, 7 }
 0x5be   :  { %v2238_v3 = vadd.f32 %v2237_v22, %v2139_v19 }
 0x5bf   :  { %v2433_v10 = vsel %vm1030_vm1, %v2432_v51, %v2426_v29  ;;  %v2532_v47 = vsel %vm1030_vm1, %v2531_v8, %v2525_v5 }
 0x5c0   :  { %v2337_v53 = vadd.f32 %v2336_v48, %v2238_v3  ;;  %v2435_v18 = vmul.f32 %v2433_v10, %v3675_v58  ;;  %v2534_v0 = vmul.f32 %v2532_v47, %v2509_v63 }
 0x5c2   :  { %v2436_v12 = vadd.f32 %v2435_v18, %v2337_v53 }
 0x5c4   :  { %v2535_v1 = vadd.f32 %v2534_v0, %v2436_v12 }
 0x5c5   :  { %2963 = shalt.err (!%p2960_p0)
}
 0x5c6   :  { %2576 = dma.vmem_to_hbm [thread:$0]  %s2571_s3, 512, %s3739_s13, [#allocation9], %s3001_s28, %s3001_s28, %s3002_s29   ;;  %v3759_v4 = vld [vmem:[#allocation14_spill] sm:$0xff]  ;;  %v3760_v45 = vld [vmem:[#allocation19_spill] sm:$0xff] }
 0x5c7   :  { %2541 = vrot.lane.b32.xlu1 %v2535_v1, %s3021_s10  ;;  %2537 = vrot.lane.b32.xlu0 %v2535_v1, %s3009_s0  ;;  %s3039_s1 = smov [#allocation7]  }
 0x5c8   :  { %s2561_s7 = sshll.u32 %s3039_s1, 4  ;;  %s2562_s7 = int_to_ptr.vmem [resolvable:$true] %s2561_s7 }
 0x5c9   :  { %s2972_s13 = scalar_lea.vmem %s2562_s7, 32  ;;  %p2977_p2 = scmp.lt.s32.totalorder %s2562_s7, %s2562_s7 }
 0x5ca   :  { %p2973_p1 = scmp.ne.s32.totalorder %s2562_s7, %s2972_s13  ;;  %p2978_p3 = scmp.lt.s32.totalorder %s2972_s13, %s2972_s13 }
 0x5cb   :  { %2549 = vrot.lane.b32.xlu1 %v3759_v4, %s3021_s10  ;;  %2545 = vrot.lane.b32.xlu0 %v2535_v1, %s3037_s16 }
 0x5cc   :  { %p2979_p4 = por %p2978_p3, %p2977_p2 }
 0x5ce   :  { %p2980_p5 = pnand %p2979_p4, %p2973_p1 }
 0x639   :  { %v2538_v21 = vpop.permute.xlu0 %2537  ;;  %v2542_v58 = vpop.permute.xlu1 %2541 }
 0x63a   :  { %v2540_v27 = vadd.f32 %v2538_v21, %v2535_v1 }
 0x63c   :  { %v2544_v14 = vadd.f32 %v2542_v58, %v2540_v27 }
 0x63d   :  { %v2546_v49 = vpop.permute.xlu0 %2545  ;;  %v2550_v41 = vpop.permute.xlu1 %2549 }
 0x63e   :  { %v2548_v62 = vadd.f32 %v2546_v49, %v2544_v14 }
 0x640   :  { %v2552_v31 = vsel %vm202_vm5, %v2548_v62, %v3760_v45 }
 0x641   :  { %v2553_v9 = vsel %vm516_vm12, %v2552_v31, %v2550_v41 }
 0x642   :  { %2554 = vst [vmem:[#allocation7] sm:$0x3] %v2553_v9 }
 0x643   :  { %2983 = shalt.err (!%p2980_p5)
}
 0x644   :  { %2564 = dma.vmem_to_hbm [thread:$0]  %s2562_s7, 32, %s3738_s12, [#allocation4]  }
 0x645   :  { %2996 = dma.done.wait [#allocation4], 32  }
 0x646   :  { %2997 = vsyncadd [#allocation4], 4294967264 }
 0x647   :  { %2998 = dma.done.wait [#allocation9], 512  }
 0x648   :  { %2999 = vsyncadd [#allocation9], 4294966784 }
 0x649   :  { %2583 = vsyncpa [#allocation3], 1 }
 0x64a   :  { %2584 = vsyncpa [#allocation6], 1 }
 0x64b   :  { %2585 = vsyncpa [#allocation4], 1 }
 0x64c   :  { %2586 = vsyncpa [#allocation9], 1 }

</bundles_post_ra>
